<compile_context>
chip_gen: v7x
topology: tpu7x:2x2x1
jax: 0.10.0
libtpu: 0.0.40
codegen_flags: <defaults>
</compile_context>

<pallas_src>
import numpy as np
import jax
import jax.numpy as jnp
from jax.experimental import pallas as pl
from jax.experimental.pallas import tpu as pltpu


# ----------------------------------------------------------------------------
# Fused forward kernel (whole network in one pallas_call)
# ----------------------------------------------------------------------------

def _full_spec(shape):
    nd = len(shape)
    return pl.BlockSpec(shape, lambda i, _nd=nd: (0,) * _nd)


def make_fused_forward(config):
    domains = config["domains"]
    n_dom = len(domains)
    ctx_sizes = [d[0] for d in domains]
    in_dims = [d[1] for d in domains]
    emb_dims = [d[2] for d in domains]
    attn_dims = list(config["attention_blocks"])
    out_dims = list(config["output_dims"])
    n_blk = len(attn_dims)

    def kernel(*refs):
        it = iter(refs)
        x_refs = [next(it) for _ in range(n_dom)]
        emb_refs = [(next(it), next(it), next(it)) for _ in range(n_dom)]
        blk_refs = [[(next(it), next(it), next(it), next(it))
                     for _ in range(n_dom)] for _ in range(n_blk)]
        outw_refs = [(next(it), next(it)) for _ in range(n_dom)]
        out_refs = [next(it) for _ in range(n_dom)]

        B = x_refs[0].shape[0]

        # ---- input embedding + positional embedding (kept in VMEM) ----
        x = []
        for i in range(n_dom):
            C, D, E = ctx_sizes[i], in_dims[i], emb_dims[i]
            w_ref, b_ref, p_ref = emb_refs[i]
            h = jnp.dot(x_refs[i][...].reshape(B * C, D), w_ref[...],
                        preferred_element_type=jnp.float32) + b_ref[...]
            h = h.reshape(B, C, E) + p_ref[...][None, :, :]
            x.append(h)

        # ---- attention blocks ----
        for b in range(n_blk):
            A = attn_dims[b]
            # fused QKV projection per domain; concat along the seq axis
            qkv_parts = []
            for i in range(n_dom):
                C, E = ctx_sizes[i], emb_dims[i]
                w_qkv, b_qkv, _, _ = blk_refs[b][i]
                h = jnp.dot(x[i].reshape(B * C, E), w_qkv[...],
                            preferred_element_type=jnp.float32) + b_qkv[...]
                qkv_parts.append(h.reshape(B, C, 3 * A))
            qkv = jnp.concatenate(qkv_parts, axis=1)        # (B, T, 3A)

            q = qkv[:, :, 0:A]          # 1/scale already folded into q weights
            k = qkv[:, :, A:2 * A]
            v = qkv[:, :, 2 * A:3 * A]

            s = jnp.einsum("bqd,bkd->bqk", q, k,
                           preferred_element_type=jnp.float32)  # (B, T, T)
            # softmax over the *query* axis (torch dim=-2)
            m = jnp.max(s, axis=1, keepdims=True)
            e = jnp.exp(s - m)
            p = e / jnp.sum(e, axis=1, keepdims=True)
            ev = jnp.einsum("bqk,bkd->bqd", p, v,
                            preferred_element_type=jnp.float32)  # (B, T, A)

            # per-domain output projection + ReLU + residual, fused
            off = 0
            for i in range(n_dom):
                C, E = ctx_sizes[i], emb_dims[i]
                part = ev[:, off:off + C, :]
                off += C
                _, _, w_o, b_o = blk_refs[b][i]
                proj = jnp.dot(part.reshape(B * C, A), w_o[...],
                               preferred_element_type=jnp.float32) + b_o[...]
                proj = jnp.maximum(proj, 0.0).reshape(B, C, E)
                x[i] = x[i] + proj

        # ---- final per-domain output heads ----
        for i in range(n_dom):
            C, E = ctx_sizes[i], emb_dims[i]
            w_out, b_out = outw_refs[i]
            y = jnp.dot(x[i].reshape(B * C, E), w_out[...],
                        preferred_element_type=jnp.float32) + b_out[...]
            out_refs[i][...] = y.reshape(B, C, out_dims[i]).astype(out_refs[i].dtype)

    def forward(packed, xs):
        B = xs[0].shape[0]
        flat = list(xs)
        for i in range(n_dom):
            w, b2, pe = packed["input_emb"][i]
            flat += [w, b2, pe]
        for blk in packed["blocks"]:
            for i in range(n_dom):
                w_qkv, b_qkv, w_o, b_o = blk[i]
                flat += [w_qkv, b_qkv, w_o, b_o]
        for i in range(n_dom):
            w, b2 = packed["output"][i]
            flat += [w, b2]

        out_shapes = tuple(
            jax.ShapeDtypeStruct((B, ctx_sizes[i], out_dims[i]), jnp.float32)
            for i in range(n_dom))

        fn = pl.pallas_call(
            kernel,
            out_shape=out_shapes,
            grid=(1,),
            in_specs=[_full_spec(a.shape) for a in flat],
            out_specs=tuple(_full_spec(o.shape) for o in out_shapes),
            compiler_params=pltpu.CompilerParams(
                dimension_semantics=("arbitrary",)),
        )
        return list(fn(*flat))

    return forward


# ----------------------------------------------------------------------------
# Parameters (PyTorch nn.Linear default init) + packing for the fused kernel
# ----------------------------------------------------------------------------

def _init_linear(key, din, dout):
    kw, kb = jax.random.split(key)
    bound = 1.0 / float(np.sqrt(din))
    w = jax.random.uniform(kw, (din, dout), jnp.float32, -bound, bound)
    b = jax.random.uniform(kb, (dout,), jnp.float32, -bound, bound)
    return w, b


def init_params(key, config):
    params = {"input_emb": [], "pos_emb": [], "blocks": [], "output": []}
    current_dims = []
    for (ctx, din, emb) in config["domains"]:
        key, sub = jax.random.split(key)
        params["input_emb"].append(_init_linear(sub, din, emb))
        params["pos_emb"].append(jnp.zeros((ctx, emb), jnp.float32))
        current_dims.append(emb)
    for a in config["attention_blocks"]:
        blk = {"attention_dims": a, "k": [], "q": [], "v": [], "o": []}
        for dim in current_dims:
            key, k1, k2, k3, k4 = jax.random.split(key, 5)
            blk["k"].append(_init_linear(k1, dim, a))
            blk["q"].append(_init_linear(k2, dim, a))
            blk["v"].append(_init_linear(k3, dim, a))
            blk["o"].append(_init_linear(k4, a, dim))
        params["blocks"].append(blk)
    for od, cd in zip(config["output_dims"], current_dims):
        key, sub = jax.random.split(key)
        params["output"].append(_init_linear(sub, cd, od))
    return params


def pack_params(params):
    """Fuse QKV weights per domain and fold 1/sqrt(A) into the Q projection."""
    packed = {"input_emb": [], "blocks": [], "output": []}
    for (w, b), pe in zip(params["input_emb"], params["pos_emb"]):
        packed["input_emb"].append((w, b.reshape(1, -1), pe))
    for blk in params["blocks"]:
        scale = float(np.sqrt(blk["attention_dims"]))
        per_dom = []
        for (wq, bq), (wk, bk), (wv, bv), (wo, bo) in zip(
                blk["q"], blk["k"], blk["v"], blk["o"]):
            w_qkv = jnp.concatenate([wq / scale, wk, wv], axis=1)
            b_qkv = jnp.concatenate([bq / scale, bk, bv], axis=0).reshape(1, -1)
            per_dom.append((w_qkv, b_qkv, wo, bo.reshape(1, -1)))
        packed["blocks"].append(per_dom)
    for (w, b) in params["output"]:
        packed["output"].append((w, b.reshape(1, -1)))
    return packed


# ----------------------------------------------------------------------------
# Pure-JAX reference (mirrors the PyTorch module) for a correctness check
# ----------------------------------------------------------------------------

def reference_forward(params, xs):
    hi = "highest"
    ctx = [d.shape[-2] for d in xs]
    x = [jnp.einsum("bcd,de->bce", d, w, precision=hi) + b + pe[None]
         for d, (w, b), pe in zip(xs, params["input_emb"], params["pos_emb"])]
    for blk in params["blocks"]:
        scale = float(np.sqrt(blk["attention_dims"]))
        ks = [jnp.einsum("bce,ea->bca", d, w, precision=hi) + b
              for d, (w, b) in zip(x, blk["k"])]
        qs = [jnp.einsum("bce,ea->bca", d, w, precision=hi) + b
              for d, (w, b) in zip(x, blk["q"])]
        vs = [jnp.einsum("bce,ea->bca", d, w, precision=hi) + b
              for d, (w, b) in zip(x, blk["v"])]
        K = jnp.concatenate(ks, axis=-2)
        Q = jnp.concatenate(qs, axis=-2)
        V = jnp.concatenate(vs, axis=-2)
        s = jnp.einsum("bqa,bka->bqk", Q, K, precision=hi) / scale
        p = jax.nn.softmax(s, axis=-2)          # softmax over the query axis
        ev = jnp.einsum("bqk,bka->bqa", p, V, precision=hi)
        parts = jnp.split(ev, list(np.cumsum(ctx)[:-1]), axis=-2)
        new = [jnp.maximum(jnp.einsum("bca,ae->bce", pt, w, precision=hi) + b, 0.0)
               for pt, (w, b) in zip(parts, blk["o"])]
        x = [o + n for o, n in zip(x, new)]
    return [jnp.einsum("bce,eo->bco", d, w, precision=hi) + b
            for d, (w, b) in zip(x, params["output"])]


# ----------------------------------------------------------------------------
# Main
# ----------------------------------------------------------------------------

if __name__ == "__main__":
    config = {
        # (ctx_size, input_dims, embed_dims)
        "domains": [(8, 6, 32), (8, 12, 32)],
        "attention_blocks": [16, 16],
        "output_dims": [4, 5],
    }
    batch = 2

    key = jax.random.PRNGKey(0)
    key, pkey = jax.random.split(key)
    params = init_params(pkey, config)
    packed = pack_params(params)

    xs = []
    for (ctx, din, _emb) in config["domains"]:
        key, sub = jax.random.split(key)
        xs.append(jax.random.normal(sub, (batch, ctx, din), jnp.float32))

    fused_forward = make_fused_forward(config)
    outs = fused_forward(packed, xs)
    outs = jax.block_until_ready(outs)

    # shape check
    for o, (ctx, _din, _emb), od in zip(outs, config["domains"],
                                        config["output_dims"]):
        assert o.shape == (batch, ctx, od), o.shape

    # numerical check against the pure-JAX reference of the PyTorch module
    refs = jax.block_until_ready(reference_forward(params, xs))
    for o, r in zip(outs, refs):
        np.testing.assert_allclose(np.asarray(o), np.asarray(r),
                                   rtol=2e-2, atol=2e-2)

    print("KERNEL_OK")
</pallas_src>

<mosaic_0001>
module attributes {stable_mosaic.version = 11 : i64} {
  func.func @kernel(%arg0: i32, %arg1: memref<2x8x6xf32, #tpu.memory_space<vmem>>, %arg2: memref<2x8x12xf32, #tpu.memory_space<vmem>>, %arg3: memref<6x32xf32, #tpu.memory_space<vmem>>, %arg4: memref<1x32xf32, #tpu.memory_space<vmem>>, %arg5: memref<8x32xf32, #tpu.memory_space<vmem>>, %arg6: memref<12x32xf32, #tpu.memory_space<vmem>>, %arg7: memref<1x32xf32, #tpu.memory_space<vmem>>, %arg8: memref<8x32xf32, #tpu.memory_space<vmem>>, %arg9: memref<32x48xf32, #tpu.memory_space<vmem>>, %arg10: memref<1x48xf32, #tpu.memory_space<vmem>>, %arg11: memref<16x32xf32, #tpu.memory_space<vmem>>, %arg12: memref<1x32xf32, #tpu.memory_space<vmem>>, %arg13: memref<32x48xf32, #tpu.memory_space<vmem>>, %arg14: memref<1x48xf32, #tpu.memory_space<vmem>>, %arg15: memref<16x32xf32, #tpu.memory_space<vmem>>, %arg16: memref<1x32xf32, #tpu.memory_space<vmem>>, %arg17: memref<32x48xf32, #tpu.memory_space<vmem>>, %arg18: memref<1x48xf32, #tpu.memory_space<vmem>>, %arg19: memref<16x32xf32, #tpu.memory_space<vmem>>, %arg20: memref<1x32xf32, #tpu.memory_space<vmem>>, %arg21: memref<32x48xf32, #tpu.memory_space<vmem>>, %arg22: memref<1x48xf32, #tpu.memory_space<vmem>>, %arg23: memref<16x32xf32, #tpu.memory_space<vmem>>, %arg24: memref<1x32xf32, #tpu.memory_space<vmem>>, %arg25: memref<32x4xf32, #tpu.memory_space<vmem>>, %arg26: memref<1x4xf32, #tpu.memory_space<vmem>>, %arg27: memref<32x5xf32, #tpu.memory_space<vmem>>, %arg28: memref<1x5xf32, #tpu.memory_space<vmem>>, %arg29: memref<2x8x4xf32, #tpu.memory_space<vmem>>, %arg30: memref<2x8x5xf32, #tpu.memory_space<vmem>>) attributes {dimension_semantics = [#tpu.dimension_semantics<arbitrary>], iteration_bounds = array<i64: 1>, scalar_prefetch = 0 : i64, scratch_operands = 0 : i64, tpu.core_type = #tpu.core_type<tc>, window_params = [{pipeline_mode = #tpu.pipeline_mode<synchronous>, transform_indices = @transform_0, window_bounds = array<i64: 2, 8, 6>}, {pipeline_mode = #tpu.pipeline_mode<synchronous>, transform_indices = @transform_1, window_bounds = array<i64: 2, 8, 12>}, {pipeline_mode = #tpu.pipeline_mode<synchronous>, transform_indices = @transform_2, window_bounds = array<i64: 6, 32>}, {pipeline_mode = #tpu.pipeline_mode<synchronous>, transform_indices = @transform_3, window_bounds = array<i64: 1, 32>}, {pipeline_mode = #tpu.pipeline_mode<synchronous>, transform_indices = @transform_4, window_bounds = array<i64: 8, 32>}, {pipeline_mode = #tpu.pipeline_mode<synchronous>, transform_indices = @transform_5, window_bounds = array<i64: 12, 32>}, {pipeline_mode = #tpu.pipeline_mode<synchronous>, transform_indices = @transform_6, window_bounds = array<i64: 1, 32>}, {pipeline_mode = #tpu.pipeline_mode<synchronous>, transform_indices = @transform_7, window_bounds = array<i64: 8, 32>}, {pipeline_mode = #tpu.pipeline_mode<synchronous>, transform_indices = @transform_8, window_bounds = array<i64: 32, 48>}, {pipeline_mode = #tpu.pipeline_mode<synchronous>, transform_indices = @transform_9, window_bounds = array<i64: 1, 48>}, {pipeline_mode = #tpu.pipeline_mode<synchronous>, transform_indices = @transform_10, window_bounds = array<i64: 16, 32>}, {pipeline_mode = #tpu.pipeline_mode<synchronous>, transform_indices = @transform_11, window_bounds = array<i64: 1, 32>}, {pipeline_mode = #tpu.pipeline_mode<synchronous>, transform_indices = @transform_12, window_bounds = array<i64: 32, 48>}, {pipeline_mode = #tpu.pipeline_mode<synchronous>, transform_indices = @transform_13, window_bounds = array<i64: 1, 48>}, {pipeline_mode = #tpu.pipeline_mode<synchronous>, transform_indices = @transform_14, window_bounds = array<i64: 16, 32>}, {pipeline_mode = #tpu.pipeline_mode<synchronous>, transform_indices = @transform_15, window_bounds = array<i64: 1, 32>}, {pipeline_mode = #tpu.pipeline_mode<synchronous>, transform_indices = @transform_16, window_bounds = array<i64: 32, 48>}, {pipeline_mode = #tpu.pipeline_mode<synchronous>, transform_indices = @transform_17, window_bounds = array<i64: 1, 48>}, {pipeline_mode = #tpu.pipeline_mode<synchronous>, transform_indices = @transform_18, window_bounds = array<i64: 16, 32>}, {pipeline_mode = #tpu.pipeline_mode<synchronous>, transform_indices = @transform_19, window_bounds = array<i64: 1, 32>}, {pipeline_mode = #tpu.pipeline_mode<synchronous>, transform_indices = @transform_20, window_bounds = array<i64: 32, 48>}, {pipeline_mode = #tpu.pipeline_mode<synchronous>, transform_indices = @transform_21, window_bounds = array<i64: 1, 48>}, {pipeline_mode = #tpu.pipeline_mode<synchronous>, transform_indices = @transform_22, window_bounds = array<i64: 16, 32>}, {pipeline_mode = #tpu.pipeline_mode<synchronous>, transform_indices = @transform_23, window_bounds = array<i64: 1, 32>}, {pipeline_mode = #tpu.pipeline_mode<synchronous>, transform_indices = @transform_24, window_bounds = array<i64: 32, 4>}, {pipeline_mode = #tpu.pipeline_mode<synchronous>, transform_indices = @transform_25, window_bounds = array<i64: 1, 4>}, {pipeline_mode = #tpu.pipeline_mode<synchronous>, transform_indices = @transform_26, window_bounds = array<i64: 32, 5>}, {pipeline_mode = #tpu.pipeline_mode<synchronous>, transform_indices = @transform_27, window_bounds = array<i64: 1, 5>}, {pipeline_mode = #tpu.pipeline_mode<synchronous>, transform_indices = @transform_28, window_bounds = array<i64: 2, 8, 4>}, {pipeline_mode = #tpu.pipeline_mode<synchronous>, transform_indices = @transform_29, window_bounds = array<i64: 2, 8, 5>}]} {
    %c0 = arith.constant 0 : index
    %c0_0 = arith.constant 0 : index
    %c0_1 = arith.constant 0 : index
    %0 = vector.load %arg1[%c0, %c0_0, %c0_1] : memref<2x8x6xf32, #tpu.memory_space<vmem>>, vector<2x8x6xf32>
    %1 = vector.shape_cast %0 : vector<2x8x6xf32> to vector<16x6xf32>
    %c0_2 = arith.constant 0 : index
    %c0_3 = arith.constant 0 : index
    %2 = vector.load %arg3[%c0_2, %c0_3] : memref<6x32xf32, #tpu.memory_space<vmem>>, vector<6x32xf32>
    %cst = arith.constant dense<0.000000e+00> : vector<16x32xf32>
    %3 = tpu.matmul %1, %2, %cst {dimension_numbers = #tpu.dot_dimension_numbers<[1], [0], [0], [1], [0, 0, 1, 1], [], []>} : vector<16x6xf32>, vector<6x32xf32>, vector<16x32xf32> -> vector<16x32xf32>
    %c0_4 = arith.constant 0 : index
    %c0_5 = arith.constant 0 : index
    %4 = vector.load %arg4[%c0_4, %c0_5] : memref<1x32xf32, #tpu.memory_space<vmem>>, vector<1x32xf32>
    %5 = vector.broadcast %4 : vector<1x32xf32> to vector<16x32xf32>
    %6 = arith.addf %3, %5 : vector<16x32xf32>
    %7 = vector.shape_cast %6 : vector<16x32xf32> to vector<2x8x32xf32>
    %c0_6 = arith.constant 0 : index
    %c0_7 = arith.constant 0 : index
    %8 = vector.load %arg5[%c0_6, %c0_7] : memref<8x32xf32, #tpu.memory_space<vmem>>, vector<8x32xf32>
    %9 = vector.shape_cast %8 : vector<8x32xf32> to vector<1x8x32xf32>
    %10 = vector.broadcast %9 : vector<1x8x32xf32> to vector<2x8x32xf32>
    %11 = arith.addf %7, %10 : vector<2x8x32xf32>
    %c0_8 = arith.constant 0 : index
    %c0_9 = arith.constant 0 : index
    %c0_10 = arith.constant 0 : index
    %12 = vector.load %arg2[%c0_8, %c0_9, %c0_10] : memref<2x8x12xf32, #tpu.memory_space<vmem>>, vector<2x8x12xf32>
    %13 = vector.shape_cast %12 : vector<2x8x12xf32> to vector<16x12xf32>
    %c0_11 = arith.constant 0 : index
    %c0_12 = arith.constant 0 : index
    %14 = vector.load %arg6[%c0_11, %c0_12] : memref<12x32xf32, #tpu.memory_space<vmem>>, vector<12x32xf32>
    %cst_13 = arith.constant dense<0.000000e+00> : vector<16x32xf32>
    %15 = tpu.matmul %13, %14, %cst_13 {dimension_numbers = #tpu.dot_dimension_numbers<[1], [0], [0], [1], [0, 0, 1, 1], [], []>} : vector<16x12xf32>, vector<12x32xf32>, vector<16x32xf32> -> vector<16x32xf32>
    %c0_14 = arith.constant 0 : index
    %c0_15 = arith.constant 0 : index
    %16 = vector.load %arg7[%c0_14, %c0_15] : memref<1x32xf32, #tpu.memory_space<vmem>>, vector<1x32xf32>
    %17 = vector.broadcast %16 : vector<1x32xf32> to vector<16x32xf32>
    %18 = arith.addf %15, %17 : vector<16x32xf32>
    %19 = vector.shape_cast %18 : vector<16x32xf32> to vector<2x8x32xf32>
    %c0_16 = arith.constant 0 : index
    %c0_17 = arith.constant 0 : index
    %20 = vector.load %arg8[%c0_16, %c0_17] : memref<8x32xf32, #tpu.memory_space<vmem>>, vector<8x32xf32>
    %21 = vector.shape_cast %20 : vector<8x32xf32> to vector<1x8x32xf32>
    %22 = vector.broadcast %21 : vector<1x8x32xf32> to vector<2x8x32xf32>
    %23 = arith.addf %19, %22 : vector<2x8x32xf32>
    %24 = vector.shape_cast %11 : vector<2x8x32xf32> to vector<16x32xf32>
    %c0_18 = arith.constant 0 : index
    %c0_19 = arith.constant 0 : index
    %25 = vector.load %arg9[%c0_18, %c0_19] : memref<32x48xf32, #tpu.memory_space<vmem>>, vector<32x48xf32>
    %cst_20 = arith.constant dense<0.000000e+00> : vector<16x48xf32>
    %26 = tpu.matmul %24, %25, %cst_20 {dimension_numbers = #tpu.dot_dimension_numbers<[1], [0], [0], [1], [0, 0, 1, 1], [], []>} : vector<16x32xf32>, vector<32x48xf32>, vector<16x48xf32> -> vector<16x48xf32>
    %c0_21 = arith.constant 0 : index
    %c0_22 = arith.constant 0 : index
    %27 = vector.load %arg10[%c0_21, %c0_22] : memref<1x48xf32, #tpu.memory_space<vmem>>, vector<1x48xf32>
    %28 = vector.broadcast %27 : vector<1x48xf32> to vector<16x48xf32>
    %29 = arith.addf %26, %28 : vector<16x48xf32>
    %30 = vector.shape_cast %29 : vector<16x48xf32> to vector<2x8x48xf32>
    %31 = vector.shape_cast %23 : vector<2x8x32xf32> to vector<16x32xf32>
    %c0_23 = arith.constant 0 : index
    %c0_24 = arith.constant 0 : index
    %32 = vector.load %arg13[%c0_23, %c0_24] : memref<32x48xf32, #tpu.memory_space<vmem>>, vector<32x48xf32>
    %cst_25 = arith.constant dense<0.000000e+00> : vector<16x48xf32>
    %33 = tpu.matmul %31, %32, %cst_25 {dimension_numbers = #tpu.dot_dimension_numbers<[1], [0], [0], [1], [0, 0, 1, 1], [], []>} : vector<16x32xf32>, vector<32x48xf32>, vector<16x48xf32> -> vector<16x48xf32>
    %c0_26 = arith.constant 0 : index
    %c0_27 = arith.constant 0 : index
    %34 = vector.load %arg14[%c0_26, %c0_27] : memref<1x48xf32, #tpu.memory_space<vmem>>, vector<1x48xf32>
    %35 = vector.broadcast %34 : vector<1x48xf32> to vector<16x48xf32>
    %36 = arith.addf %33, %35 : vector<16x48xf32>
    %37 = vector.shape_cast %36 : vector<16x48xf32> to vector<2x8x48xf32>
    %38 = tpu.concatenate %30, %37 in 1 : vector<2x8x48xf32>, vector<2x8x48xf32> -> vector<2x16x48xf32>
    %39 = vector.extract_strided_slice %38 {offsets = [0, 0, 0], sizes = [2, 16, 16], strides = [1, 1, 1]} : vector<2x16x48xf32> to vector<2x16x16xf32>
    %40 = vector.extract_strided_slice %38 {offsets = [0, 0, 16], sizes = [2, 16, 16], strides = [1, 1, 1]} : vector<2x16x48xf32> to vector<2x16x16xf32>
    %41 = vector.extract_strided_slice %38 {offsets = [0, 0, 32], sizes = [2, 16, 16], strides = [1, 1, 1]} : vector<2x16x48xf32> to vector<2x16x16xf32>
    "tpu.trace_start"() <{level = 10 : i32, message = "bqd,bkd->bqk"}> : () -> ()
    %cst_28 = arith.constant dense<0.000000e+00> : vector<2x16x16xf32>
    %42 = tpu.matmul %39, %40, %cst_28 {dimension_numbers = #tpu.dot_dimension_numbers<[2], [2], [1], [1], [0, 0, 0, 1, 1, 1], [0], [0]>} : vector<2x16x16xf32>, vector<2x16x16xf32>, vector<2x16x16xf32> -> vector<2x16x16xf32>
    "tpu.trace_stop"() : () -> ()
    %cst_29 = arith.constant dense<0xFF800000> : vector<2x16xf32>
    %43 = vector.multi_reduction <maximumf>, %42, %cst_29 [1] : vector<2x16x16xf32> to vector<2x16xf32>
    %44 = vector.shape_cast %43 : vector<2x16xf32> to vector<2x1x16xf32>
    %45 = vector.broadcast %44 : vector<2x1x16xf32> to vector<2x16x16xf32>
    %46 = arith.subf %42, %45 : vector<2x16x16xf32>
    %47 = math.exp %46 : vector<2x16x16xf32>
    %cst_30 = arith.constant dense<0.000000e+00> : vector<2x16xf32>
    %48 = vector.multi_reduction <add>, %47, %cst_30 [1] : vector<2x16x16xf32> to vector<2x16xf32>
    %49 = vector.shape_cast %48 : vector<2x16xf32> to vector<2x1x16xf32>
    %50 = vector.broadcast %49 : vector<2x1x16xf32> to vector<2x16x16xf32>
    %51 = arith.divf %47, %50 : vector<2x16x16xf32>
    "tpu.trace_start"() <{level = 10 : i32, message = "bqk,bkd->bqd"}> : () -> ()
    %cst_31 = arith.constant dense<0.000000e+00> : vector<2x16x16xf32>
    %52 = tpu.matmul %51, %41, %cst_31 {dimension_numbers = #tpu.dot_dimension_numbers<[2], [1], [1], [2], [0, 0, 0, 1, 1, 2], [0], [0]>} : vector<2x16x16xf32>, vector<2x16x16xf32>, vector<2x16x16xf32> -> vector<2x16x16xf32>
    "tpu.trace_stop"() : () -> ()
    %53 = vector.extract_strided_slice %52 {offsets = [0, 0, 0], sizes = [2, 8, 16], strides = [1, 1, 1]} : vector<2x16x16xf32> to vector<2x8x16xf32>
    %54 = vector.shape_cast %53 : vector<2x8x16xf32> to vector<16x16xf32>
    %c0_32 = arith.constant 0 : index
    %c0_33 = arith.constant 0 : index
    %55 = vector.load %arg11[%c0_32, %c0_33] : memref<16x32xf32, #tpu.memory_space<vmem>>, vector<16x32xf32>
    %cst_34 = arith.constant dense<0.000000e+00> : vector<16x32xf32>
    %56 = tpu.matmul %54, %55, %cst_34 {dimension_numbers = #tpu.dot_dimension_numbers<[1], [0], [0], [1], [0, 0, 1, 1], [], []>} : vector<16x16xf32>, vector<16x32xf32>, vector<16x32xf32> -> vector<16x32xf32>
    %c0_35 = arith.constant 0 : index
    %c0_36 = arith.constant 0 : index
    %57 = vector.load %arg12[%c0_35, %c0_36] : memref<1x32xf32, #tpu.memory_space<vmem>>, vector<1x32xf32>
    %58 = vector.broadcast %57 : vector<1x32xf32> to vector<16x32xf32>
    %59 = arith.addf %56, %58 : vector<16x32xf32>
    %cst_37 = arith.constant 0.000000e+00 : f32
    %60 = vector.broadcast %cst_37 : f32 to vector<16x32xf32>
    %61 = arith.maximumf %59, %60 : vector<16x32xf32>
    %62 = vector.shape_cast %61 : vector<16x32xf32> to vector<2x8x32xf32>
    %63 = arith.addf %11, %62 : vector<2x8x32xf32>
    %64 = vector.extract_strided_slice %52 {offsets = [0, 8, 0], sizes = [2, 8, 16], strides = [1, 1, 1]} : vector<2x16x16xf32> to vector<2x8x16xf32>
    %65 = vector.shape_cast %64 : vector<2x8x16xf32> to vector<16x16xf32>
    %c0_38 = arith.constant 0 : index
    %c0_39 = arith.constant 0 : index
    %66 = vector.load %arg15[%c0_38, %c0_39] : memref<16x32xf32, #tpu.memory_space<vmem>>, vector<16x32xf32>
    %cst_40 = arith.constant dense<0.000000e+00> : vector<16x32xf32>
    %67 = tpu.matmul %65, %66, %cst_40 {dimension_numbers = #tpu.dot_dimension_numbers<[1], [0], [0], [1], [0, 0, 1, 1], [], []>} : vector<16x16xf32>, vector<16x32xf32>, vector<16x32xf32> -> vector<16x32xf32>
    %c0_41 = arith.constant 0 : index
    %c0_42 = arith.constant 0 : index
    %68 = vector.load %arg16[%c0_41, %c0_42] : memref<1x32xf32, #tpu.memory_space<vmem>>, vector<1x32xf32>
    %69 = vector.broadcast %68 : vector<1x32xf32> to vector<16x32xf32>
    %70 = arith.addf %67, %69 : vector<16x32xf32>
    %cst_43 = arith.constant 0.000000e+00 : f32
    %71 = vector.broadcast %cst_43 : f32 to vector<16x32xf32>
    %72 = arith.maximumf %70, %71 : vector<16x32xf32>
    %73 = vector.shape_cast %72 : vector<16x32xf32> to vector<2x8x32xf32>
    %74 = arith.addf %23, %73 : vector<2x8x32xf32>
    %75 = vector.shape_cast %63 : vector<2x8x32xf32> to vector<16x32xf32>
    %c0_44 = arith.constant 0 : index
    %c0_45 = arith.constant 0 : index
    %76 = vector.load %arg17[%c0_44, %c0_45] : memref<32x48xf32, #tpu.memory_space<vmem>>, vector<32x48xf32>
    %cst_46 = arith.constant dense<0.000000e+00> : vector<16x48xf32>
    %77 = tpu.matmul %75, %76, %cst_46 {dimension_numbers = #tpu.dot_dimension_numbers<[1], [0], [0], [1], [0, 0, 1, 1], [], []>} : vector<16x32xf32>, vector<32x48xf32>, vector<16x48xf32> -> vector<16x48xf32>
    %c0_47 = arith.constant 0 : index
    %c0_48 = arith.constant 0 : index
    %78 = vector.load %arg18[%c0_47, %c0_48] : memref<1x48xf32, #tpu.memory_space<vmem>>, vector<1x48xf32>
    %79 = vector.broadcast %78 : vector<1x48xf32> to vector<16x48xf32>
    %80 = arith.addf %77, %79 : vector<16x48xf32>
    %81 = vector.shape_cast %80 : vector<16x48xf32> to vector<2x8x48xf32>
    %82 = vector.shape_cast %74 : vector<2x8x32xf32> to vector<16x32xf32>
    %c0_49 = arith.constant 0 : index
    %c0_50 = arith.constant 0 : index
    %83 = vector.load %arg21[%c0_49, %c0_50] : memref<32x48xf32, #tpu.memory_space<vmem>>, vector<32x48xf32>
    %cst_51 = arith.constant dense<0.000000e+00> : vector<16x48xf32>
    %84 = tpu.matmul %82, %83, %cst_51 {dimension_numbers = #tpu.dot_dimension_numbers<[1], [0], [0], [1], [0, 0, 1, 1], [], []>} : vector<16x32xf32>, vector<32x48xf32>, vector<16x48xf32> -> vector<16x48xf32>
    %c0_52 = arith.constant 0 : index
    %c0_53 = arith.constant 0 : index
    %85 = vector.load %arg22[%c0_52, %c0_53] : memref<1x48xf32, #tpu.memory_space<vmem>>, vector<1x48xf32>
    %86 = vector.broadcast %85 : vector<1x48xf32> to vector<16x48xf32>
    %87 = arith.addf %84, %86 : vector<16x48xf32>
    %88 = vector.shape_cast %87 : vector<16x48xf32> to vector<2x8x48xf32>
    %89 = tpu.concatenate %81, %88 in 1 : vector<2x8x48xf32>, vector<2x8x48xf32> -> vector<2x16x48xf32>
    %90 = vector.extract_strided_slice %89 {offsets = [0, 0, 0], sizes = [2, 16, 16], strides = [1, 1, 1]} : vector<2x16x48xf32> to vector<2x16x16xf32>
    %91 = vector.extract_strided_slice %89 {offsets = [0, 0, 16], sizes = [2, 16, 16], strides = [1, 1, 1]} : vector<2x16x48xf32> to vector<2x16x16xf32>
    %92 = vector.extract_strided_slice %89 {offsets = [0, 0, 32], sizes = [2, 16, 16], strides = [1, 1, 1]} : vector<2x16x48xf32> to vector<2x16x16xf32>
    "tpu.trace_start"() <{level = 10 : i32, message = "bqd,bkd->bqk"}> : () -> ()
    %cst_54 = arith.constant dense<0.000000e+00> : vector<2x16x16xf32>
    %93 = tpu.matmul %90, %91, %cst_54 {dimension_numbers = #tpu.dot_dimension_numbers<[2], [2], [1], [1], [0, 0, 0, 1, 1, 1], [0], [0]>} : vector<2x16x16xf32>, vector<2x16x16xf32>, vector<2x16x16xf32> -> vector<2x16x16xf32>
    "tpu.trace_stop"() : () -> ()
    %cst_55 = arith.constant dense<0xFF800000> : vector<2x16xf32>
    %94 = vector.multi_reduction <maximumf>, %93, %cst_55 [1] : vector<2x16x16xf32> to vector<2x16xf32>
    %95 = vector.shape_cast %94 : vector<2x16xf32> to vector<2x1x16xf32>
    %96 = vector.broadcast %95 : vector<2x1x16xf32> to vector<2x16x16xf32>
    %97 = arith.subf %93, %96 : vector<2x16x16xf32>
    %98 = math.exp %97 : vector<2x16x16xf32>
    %cst_56 = arith.constant dense<0.000000e+00> : vector<2x16xf32>
    %99 = vector.multi_reduction <add>, %98, %cst_56 [1] : vector<2x16x16xf32> to vector<2x16xf32>
    %100 = vector.shape_cast %99 : vector<2x16xf32> to vector<2x1x16xf32>
    %101 = vector.broadcast %100 : vector<2x1x16xf32> to vector<2x16x16xf32>
    %102 = arith.divf %98, %101 : vector<2x16x16xf32>
    "tpu.trace_start"() <{level = 10 : i32, message = "bqk,bkd->bqd"}> : () -> ()
    %cst_57 = arith.constant dense<0.000000e+00> : vector<2x16x16xf32>
    %103 = tpu.matmul %102, %92, %cst_57 {dimension_numbers = #tpu.dot_dimension_numbers<[2], [1], [1], [2], [0, 0, 0, 1, 1, 2], [0], [0]>} : vector<2x16x16xf32>, vector<2x16x16xf32>, vector<2x16x16xf32> -> vector<2x16x16xf32>
    "tpu.trace_stop"() : () -> ()
    %104 = vector.extract_strided_slice %103 {offsets = [0, 0, 0], sizes = [2, 8, 16], strides = [1, 1, 1]} : vector<2x16x16xf32> to vector<2x8x16xf32>
    %105 = vector.shape_cast %104 : vector<2x8x16xf32> to vector<16x16xf32>
    %c0_58 = arith.constant 0 : index
    %c0_59 = arith.constant 0 : index
    %106 = vector.load %arg19[%c0_58, %c0_59] : memref<16x32xf32, #tpu.memory_space<vmem>>, vector<16x32xf32>
    %cst_60 = arith.constant dense<0.000000e+00> : vector<16x32xf32>
    %107 = tpu.matmul %105, %106, %cst_60 {dimension_numbers = #tpu.dot_dimension_numbers<[1], [0], [0], [1], [0, 0, 1, 1], [], []>} : vector<16x16xf32>, vector<16x32xf32>, vector<16x32xf32> -> vector<16x32xf32>
    %c0_61 = arith.constant 0 : index
    %c0_62 = arith.constant 0 : index
    %108 = vector.load %arg20[%c0_61, %c0_62] : memref<1x32xf32, #tpu.memory_space<vmem>>, vector<1x32xf32>
    %109 = vector.broadcast %108 : vector<1x32xf32> to vector<16x32xf32>
    %110 = arith.addf %107, %109 : vector<16x32xf32>
    %cst_63 = arith.constant 0.000000e+00 : f32
    %111 = vector.broadcast %cst_63 : f32 to vector<16x32xf32>
    %112 = arith.maximumf %110, %111 : vector<16x32xf32>
    %113 = vector.shape_cast %112 : vector<16x32xf32> to vector<2x8x32xf32>
    %114 = arith.addf %63, %113 : vector<2x8x32xf32>
    %115 = vector.extract_strided_slice %103 {offsets = [0, 8, 0], sizes = [2, 8, 16], strides = [1, 1, 1]} : vector<2x16x16xf32> to vector<2x8x16xf32>
    %116 = vector.shape_cast %115 : vector<2x8x16xf32> to vector<16x16xf32>
    %c0_64 = arith.constant 0 : index
    %c0_65 = arith.constant 0 : index
    %117 = vector.load %arg23[%c0_64, %c0_65] : memref<16x32xf32, #tpu.memory_space<vmem>>, vector<16x32xf32>
    %cst_66 = arith.constant dense<0.000000e+00> : vector<16x32xf32>
    %118 = tpu.matmul %116, %117, %cst_66 {dimension_numbers = #tpu.dot_dimension_numbers<[1], [0], [0], [1], [0, 0, 1, 1], [], []>} : vector<16x16xf32>, vector<16x32xf32>, vector<16x32xf32> -> vector<16x32xf32>
    %c0_67 = arith.constant 0 : index
    %c0_68 = arith.constant 0 : index
    %119 = vector.load %arg24[%c0_67, %c0_68] : memref<1x32xf32, #tpu.memory_space<vmem>>, vector<1x32xf32>
    %120 = vector.broadcast %119 : vector<1x32xf32> to vector<16x32xf32>
    %121 = arith.addf %118, %120 : vector<16x32xf32>
    %cst_69 = arith.constant 0.000000e+00 : f32
    %122 = vector.broadcast %cst_69 : f32 to vector<16x32xf32>
    %123 = arith.maximumf %121, %122 : vector<16x32xf32>
    %124 = vector.shape_cast %123 : vector<16x32xf32> to vector<2x8x32xf32>
    %125 = arith.addf %74, %124 : vector<2x8x32xf32>
    %126 = vector.shape_cast %114 : vector<2x8x32xf32> to vector<16x32xf32>
    %c0_70 = arith.constant 0 : index
    %c0_71 = arith.constant 0 : index
    %127 = vector.load %arg25[%c0_70, %c0_71] : memref<32x4xf32, #tpu.memory_space<vmem>>, vector<32x4xf32>
    %cst_72 = arith.constant dense<0.000000e+00> : vector<16x4xf32>
    %128 = tpu.matmul %126, %127, %cst_72 {dimension_numbers = #tpu.dot_dimension_numbers<[1], [0], [0], [1], [0, 0, 1, 1], [], []>} : vector<16x32xf32>, vector<32x4xf32>, vector<16x4xf32> -> vector<16x4xf32>
    %c0_73 = arith.constant 0 : index
    %c0_74 = arith.constant 0 : index
    %129 = vector.load %arg26[%c0_73, %c0_74] : memref<1x4xf32, #tpu.memory_space<vmem>>, vector<1x4xf32>
    %130 = vector.broadcast %129 : vector<1x4xf32> to vector<16x4xf32>
    %131 = arith.addf %128, %130 : vector<16x4xf32>
    %132 = vector.shape_cast %131 : vector<16x4xf32> to vector<2x8x4xf32>
    %c0_75 = arith.constant 0 : index
    %c0_76 = arith.constant 0 : index
    %c0_77 = arith.constant 0 : index
    %133 = vector.load %arg29[%c0_75, %c0_76, %c0_77] : memref<2x8x4xf32, #tpu.memory_space<vmem>>, vector<2x8x4xf32>
    tpu.vector_store %arg29[%c0_75, %c0_76, %c0_77], %132 {strides = array<i32>} : memref<2x8x4xf32, #tpu.memory_space<vmem>>, vector<2x8x4xf32>,
    %134 = vector.shape_cast %125 : vector<2x8x32xf32> to vector<16x32xf32>
    %c0_78 = arith.constant 0 : index
    %c0_79 = arith.constant 0 : index
    %135 = vector.load %arg27[%c0_78, %c0_79] : memref<32x5xf32, #tpu.memory_space<vmem>>, vector<32x5xf32>
    %cst_80 = arith.constant dense<0.000000e+00> : vector<16x5xf32>
    %136 = tpu.matmul %134, %135, %cst_80 {dimension_numbers = #tpu.dot_dimension_numbers<[1], [0], [0], [1], [0, 0, 1, 1], [], []>} : vector<16x32xf32>, vector<32x5xf32>, vector<16x5xf32> -> vector<16x5xf32>
    %c0_81 = arith.constant 0 : index
    %c0_82 = arith.constant 0 : index
    %137 = vector.load %arg28[%c0_81, %c0_82] : memref<1x5xf32, #tpu.memory_space<vmem>>, vector<1x5xf32>
    %138 = vector.broadcast %137 : vector<1x5xf32> to vector<16x5xf32>
    %139 = arith.addf %136, %138 : vector<16x5xf32>
    %140 = vector.shape_cast %139 : vector<16x5xf32> to vector<2x8x5xf32>
    %c0_83 = arith.constant 0 : index
    %c0_84 = arith.constant 0 : index
    %c0_85 = arith.constant 0 : index
    %141 = vector.load %arg30[%c0_83, %c0_84, %c0_85] : memref<2x8x5xf32, #tpu.memory_space<vmem>>, vector<2x8x5xf32>
    tpu.vector_store %arg30[%c0_83, %c0_84, %c0_85], %140 {strides = array<i32>} : memref<2x8x5xf32, #tpu.memory_space<vmem>>, vector<2x8x5xf32>,
    return
  }
  func.func @transform_0(%arg0: i32) -> (i32, i32, i32) {
    %c0_i32 = arith.constant 0 : i32
    %c0_i32_0 = arith.constant 0 : i32
    %c0_i32_1 = arith.constant 0 : i32
    %c0_i32_2 = arith.constant 0 : i32
    return %c0_i32, %c0_i32_0, %c0_i32_1 : i32, i32, i32
  }
  func.func @transform_1(%arg0: i32) -> (i32, i32, i32) {
    %c0_i32 = arith.constant 0 : i32
    %c0_i32_0 = arith.constant 0 : i32
    %c0_i32_1 = arith.constant 0 : i32
    %c0_i32_2 = arith.constant 0 : i32
    return %c0_i32, %c0_i32_0, %c0_i32_1 : i32, i32, i32
  }
  func.func @transform_2(%arg0: i32) -> (i32, i32) {
    %c0_i32 = arith.constant 0 : i32
    %c0_i32_0 = arith.constant 0 : i32
    %c0_i32_1 = arith.constant 0 : i32
    return %c0_i32, %c0_i32_0 : i32, i32
  }
  func.func @transform_3(%arg0: i32) -> (i32, i32) {
    %c0_i32 = arith.constant 0 : i32
    %c0_i32_0 = arith.constant 0 : i32
    %c0_i32_1 = arith.constant 0 : i32
    return %c0_i32, %c0_i32_0 : i32, i32
  }
  func.func @transform_4(%arg0: i32) -> (i32, i32) {
    %c0_i32 = arith.constant 0 : i32
    %c0_i32_0 = arith.constant 0 : i32
    %c0_i32_1 = arith.constant 0 : i32
    return %c0_i32, %c0_i32_0 : i32, i32
  }
  func.func @transform_5(%arg0: i32) -> (i32, i32) {
    %c0_i32 = arith.constant 0 : i32
    %c0_i32_0 = arith.constant 0 : i32
    %c0_i32_1 = arith.constant 0 : i32
    return %c0_i32, %c0_i32_0 : i32, i32
  }
  func.func @transform_6(%arg0: i32) -> (i32, i32) {
    %c0_i32 = arith.constant 0 : i32
    %c0_i32_0 = arith.constant 0 : i32
    %c0_i32_1 = arith.constant 0 : i32
    return %c0_i32, %c0_i32_0 : i32, i32
  }
  func.func @transform_7(%arg0: i32) -> (i32, i32) {
    %c0_i32 = arith.constant 0 : i32
    %c0_i32_0 = arith.constant 0 : i32
    %c0_i32_1 = arith.constant 0 : i32
    return %c0_i32, %c0_i32_0 : i32, i32
  }
  func.func @transform_8(%arg0: i32) -> (i32, i32) {
    %c0_i32 = arith.constant 0 : i32
    %c0_i32_0 = arith.constant 0 : i32
    %c0_i32_1 = arith.constant 0 : i32
    return %c0_i32, %c0_i32_0 : i32, i32
  }
  func.func @transform_9(%arg0: i32) -> (i32, i32) {
    %c0_i32 = arith.constant 0 : i32
    %c0_i32_0 = arith.constant 0 : i32
    %c0_i32_1 = arith.constant 0 : i32
    return %c0_i32, %c0_i32_0 : i32, i32
  }
  func.func @transform_10(%arg0: i32) -> (i32, i32) {
    %c0_i32 = arith.constant 0 : i32
    %c0_i32_0 = arith.constant 0 : i32
    %c0_i32_1 = arith.constant 0 : i32
    return %c0_i32, %c0_i32_0 : i32, i32
  }
  func.func @transform_11(%arg0: i32) -> (i32, i32) {
    %c0_i32 = arith.constant 0 : i32
    %c0_i32_0 = arith.constant 0 : i32
    %c0_i32_1 = arith.constant 0 : i32
    return %c0_i32, %c0_i32_0 : i32, i32
  }
  func.func @transform_12(%arg0: i32) -> (i32, i32) {
    %c0_i32 = arith.constant 0 : i32
    %c0_i32_0 = arith.constant 0 : i32
    %c0_i32_1 = arith.constant 0 : i32
    return %c0_i32, %c0_i32_0 : i32, i32
  }
  func.func @transform_13(%arg0: i32) -> (i32, i32) {
    %c0_i32 = arith.constant 0 : i32
    %c0_i32_0 = arith.constant 0 : i32
    %c0_i32_1 = arith.constant 0 : i32
    return %c0_i32, %c0_i32_0 : i32, i32
  }
  func.func @transform_14(%arg0: i32) -> (i32, i32) {
    %c0_i32 = arith.constant 0 : i32
    %c0_i32_0 = arith.constant 0 : i32
    %c0_i32_1 = arith.constant 0 : i32
    return %c0_i32, %c0_i32_0 : i32, i32
  }
  func.func @transform_15(%arg0: i32) -> (i32, i32) {
    %c0_i32 = arith.constant 0 : i32
    %c0_i32_0 = arith.constant 0 : i32
    %c0_i32_1 = arith.constant 0 : i32
    return %c0_i32, %c0_i32_0 : i32, i32
  }
  func.func @transform_16(%arg0: i32) -> (i32, i32) {
    %c0_i32 = arith.constant 0 : i32
    %c0_i32_0 = arith.constant 0 : i32
    %c0_i32_1 = arith.constant 0 : i32
    return %c0_i32, %c0_i32_0 : i32, i32
  }
  func.func @transform_17(%arg0: i32) -> (i32, i32) {
    %c0_i32 = arith.constant 0 : i32
    %c0_i32_0 = arith.constant 0 : i32
    %c0_i32_1 = arith.constant 0 : i32
    return %c0_i32, %c0_i32_0 : i32, i32
  }
  func.func @transform_18(%arg0: i32) -> (i32, i32) {
    %c0_i32 = arith.constant 0 : i32
    %c0_i32_0 = arith.constant 0 : i32
    %c0_i32_1 = arith.constant 0 : i32
    return %c0_i32, %c0_i32_0 : i32, i32
  }
  func.func @transform_19(%arg0: i32) -> (i32, i32) {
    %c0_i32 = arith.constant 0 : i32
    %c0_i32_0 = arith.constant 0 : i32
    %c0_i32_1 = arith.constant 0 : i32
    return %c0_i32, %c0_i32_0 : i32, i32
  }
  func.func @transform_20(%arg0: i32) -> (i32, i32) {
    %c0_i32 = arith.constant 0 : i32
    %c0_i32_0 = arith.constant 0 : i32
    %c0_i32_1 = arith.constant 0 : i32
    return %c0_i32, %c0_i32_0 : i32, i32
  }
  func.func @transform_21(%arg0: i32) -> (i32, i32) {
    %c0_i32 = arith.constant 0 : i32
    %c0_i32_0 = arith.constant 0 : i32
    %c0_i32_1 = arith.constant 0 : i32
    return %c0_i32, %c0_i32_0 : i32, i32
  }
  func.func @transform_22(%arg0: i32) -> (i32, i32) {
    %c0_i32 = arith.constant 0 : i32
    %c0_i32_0 = arith.constant 0 : i32
    %c0_i32_1 = arith.constant 0 : i32
    return %c0_i32, %c0_i32_0 : i32, i32
  }
  func.func @transform_23(%arg0: i32) -> (i32, i32) {
    %c0_i32 = arith.constant 0 : i32
    %c0_i32_0 = arith.constant 0 : i32
    %c0_i32_1 = arith.constant 0 : i32
    return %c0_i32, %c0_i32_0 : i32, i32
  }
  func.func @transform_24(%arg0: i32) -> (i32, i32) {
    %c0_i32 = arith.constant 0 : i32
    %c0_i32_0 = arith.constant 0 : i32
    %c0_i32_1 = arith.constant 0 : i32
    return %c0_i32, %c0_i32_0 : i32, i32
  }
  func.func @transform_25(%arg0: i32) -> (i32, i32) {
    %c0_i32 = arith.constant 0 : i32
    %c0_i32_0 = arith.constant 0 : i32
    %c0_i32_1 = arith.constant 0 : i32
    return %c0_i32, %c0_i32_0 : i32, i32
  }
  func.func @transform_26(%arg0: i32) -> (i32, i32) {
    %c0_i32 = arith.constant 0 : i32
    %c0_i32_0 = arith.constant 0 : i32
    %c0_i32_1 = arith.constant 0 : i32
    return %c0_i32, %c0_i32_0 : i32, i32
  }
  func.func @transform_27(%arg0: i32) -> (i32, i32) {
    %c0_i32 = arith.constant 0 : i32
    %c0_i32_0 = arith.constant 0 : i32
    %c0_i32_1 = arith.constant 0 : i32
    return %c0_i32, %c0_i32_0 : i32, i32
  }
  func.func @transform_28(%arg0: i32) -> (i32, i32, i32) {
    %c0_i32 = arith.constant 0 : i32
    %c0_i32_0 = arith.constant 0 : i32
    %c0_i32_1 = arith.constant 0 : i32
    %c0_i32_2 = arith.constant 0 : i32
    return %c0_i32, %c0_i32_0, %c0_i32_1 : i32, i32, i32
  }
  func.func @transform_29(%arg0: i32) -> (i32, i32, i32) {
    %c0_i32 = arith.constant 0 : i32
    %c0_i32_0 = arith.constant 0 : i32
    %c0_i32_1 = arith.constant 0 : i32
    %c0_i32_2 = arith.constant 0 : i32
    return %c0_i32, %c0_i32_0, %c0_i32_1 : i32, i32, i32
  }
}

</mosaic_0001>

<bundles_post_ra>
// kernel: tpu_custom_call.1
= control target key start
LH: loop header
LB: loop body
LE: loop exit
PB: predicated region body
PF: predicated region fallthrough
CT: control target
= control target key end

     0   :  { %s3104_s6 = smov 1   ;;  %s3105_s10 = smov 2   ;;  %s3542_s0 = inlined_call_operand.smem [shape: u32[30], index: -1, kind: input, shape index: {}] }
   0x1   :  { %s3159_s5 = sld [smem:[%s3542_s0]]   ;;  %s3106_s14 = smov 3  }
   0x2   :  { %s3164_s9 = sld [smem:[%s3542_s0 + %s3104_s6]]   ;;  %s3107_s18 = smov 4  }
   0x3   :  { %s3169_s13 = sld [smem:[%s3542_s0 + %s3105_s10]]   ;;  %s3108_s22 = smov 5  }
   0x4   :  { %s3174_s17 = sld [smem:[%s3542_s0 + %s3106_s14]]   ;;  %s3109_s26 = smov 6  }
   0x5   :  { %s3179_s21 = sld [smem:[%s3542_s0 + %s3107_s18]]   ;;  %s3110_s30 = smov 7  }
   0x6   :  { %s3184_s25 = sld [smem:[%s3542_s0 + %s3108_s22]]   ;;  %s3111_s4 = smov 8  }
   0x7   :  { %s3189_s29 = sld [smem:[%s3542_s0 + %s3109_s26]]   ;;  %s3112_s10 = smov 9  }
   0x8   :  { %s3194_s3 = sld [smem:[%s3542_s0 + %s3110_s30]]   ;;  %s3113_s15 = smov 10  }
   0x9   :  { %s3199_s8 = sld [smem:[%s3542_s0 + %s3111_s4]]   ;;  %s3114_s20 = smov 11  }
   0xa   :  { %s3204_s14 = sld [smem:[%s3542_s0 + %s3112_s10]]   ;;  %s3115_s26 = smov 12  }
   0xb   :  { %s3209_s19 = sld [smem:[%s3542_s0 + %s3113_s15]]   ;;  %s3116_s1 = smov 13  }
   0xc   :  { %s3214_s24 = sld [smem:[%s3542_s0 + %s3114_s20]]   ;;  %s3117_s7 = smov 14  }
   0xd   :  { %s3219_s30 = sld [smem:[%s3542_s0 + %s3115_s26]]   ;;  %s3118_s15 = smov 15  }
   0xe   :  { %s3224_s6 = sld [smem:[%s3542_s0 + %s3116_s1]]   ;;  %s3119_s22 = smov 16  }
   0xf   :  { %3551 = sst [smem:[#allocation29_spill]] %s3199_s8  ;;  %s3120_s28 = smov 17  }
  0x10   :  { %s3229_s12 = sld [smem:[%s3542_s0 + %s3117_s7]]   ;;  %s3121_s7 = smov 18  }
  0x11   :  { %s3234_s20 = sld [smem:[%s3542_s0 + %s3118_s15]]   ;;  %s3122_s15 = smov 19  }
  0x12   :  { %s3239_s27 = sld [smem:[%s3542_s0 + %s3119_s22]]   ;;  %s3123_s22 = smov 20  }
  0x13   :  { %3552 = sst [smem:[#allocation30_spill]] %s3219_s30 }
  0x14   :  { %s3244_s4 = sld [smem:[%s3542_s0 + %s3120_s28]]   ;;  %s3124_s28 = smov 21  }
  0x15   :  { %s3254_s30 = sld [smem:[%s3542_s0 + %s3122_s15]]   ;;  %s3126_s15 = smov 23  }
  0x16   :  { %3553 = sst [smem:[#allocation31_spill]] %s3229_s12 }
  0x17   :  { %s3249_s12 = sld [smem:[%s3542_s0 + %s3121_s7]]   ;;  %s3125_s7 = smov 22  }
  0x18   :  { %3554 = sst [smem:[#allocation32_spill]] %s3239_s27 }
  0x19   :  { %s3259_s27 = sld [smem:[%s3542_s0 + %s3123_s22]]   ;;  %s3127_s22 = smov 24  }
  0x1a   :  { %3555 = sst [smem:[#allocation33_spill]] %s3244_s4 }
  0x1b   :  { %3557 = sst [smem:[#allocation35_spill]] %s3254_s30 }
  0x1c   :  { %s3264_s4 = sld [smem:[%s3542_s0 + %s3124_s28]]   ;;  %s3128_s28 = smov 25  }
  0x1d   :  { %3556 = sst [smem:[#allocation34_spill]] %s3249_s12 }
  0x1e   :  { %s3269_s12 = sld [smem:[%s3542_s0 + %s3125_s7]]   ;;  %s3129_s7 = smov 26  }
  0x1f   :  { %3558 = sst [smem:[#allocation36_spill]] %s3259_s27 }
  0x20   :  { %s3274_s30 = sld [smem:[%s3542_s0 + %s3126_s15]]   ;;  %s3130_s15 = smov 27  }
  0x21   :  { %s3279_s27 = sld [smem:[%s3542_s0 + %s3127_s22]]   ;;  %s3131_s22 = smov 28  }
  0x22   :  { %3559 = sst [smem:[#allocation37_spill]] %s3264_s4 }
  0x23   :  { %s3284_s4 = sld [smem:[%s3542_s0 + %s3128_s28]]   ;;  %s3132_s28 = smov 29  }
  0x24   :  { %3560 = sst [smem:[#allocation38_spill]] %s3269_s12 }
  0x25   :  { %s3289_s12 = sld [smem:[%s3542_s0 + %s3129_s7]]  }
  0x26   :  { %s3294_s8 = sld [smem:[%s3542_s0 + %s3130_s15]]  }
  0x27   :  { %3561 = sst [smem:[#allocation39_spill]] %s3279_s27 }
  0x28   :  { %s3299_s27 = sld [smem:[%s3542_s0 + %s3131_s22]]  }
  0x29   :  { %3562 = sst [smem:[#allocation40_spill]] %s3284_s4 }
  0x2a   :  { %s3304_s4 = sld [smem:[%s3542_s0 + %s3132_s28]]  }
  0x2b   :  { %65 = vsyncpa [#allocation3], 0 }
  0x2c   :  { %66 = vsyncpa [#allocation5], 0 }
  0x2d   :  { %67 = vsyncpa [#allocation8], 0 }
  0x2e   :  { %68 = vsyncpa [#allocation11], 0 }
  0x2f   :  { %69 = vsyncpa [#allocation14], 0 }
  0x30   :  { %70 = vsyncpa [#allocation17], 0 }
  0x31   :  { %71 = vsyncpa [#allocation20], 0  ;;  %s3133_s7 = smov [#allocation4]   ;;  %s3134_s11 = smov [#allocation7]  }
  0x32   :  { %s92_s10 = sshll.u32 %s3133_s7, 4  ;;  %s112_s15 = sshll.u32 %s3134_s11, 4  ;;  %s93_s10 = int_to_ptr.vmem [resolvable:$true] %s92_s10  ;;  %s113_s15 = int_to_ptr.vmem [resolvable:$true] %s112_s15 }
  0x33   :  { %s2804_s16 = scalar_lea.hbm %s3169_s13, 128 }
  0x34   :  { %p2805_p0 = scmp.ne.s32.totalorder %s3169_s13, %s2804_s16  ;;  %p2808_p1 = scmp.lt.u32.totalorder %s2804_s16, %s3169_s13 }
  0x36   :  { %p2810_p2 = pnand %p2808_p1, %p2805_p0 }
  0x38   :  { %2813 = shalt.err (!%p2810_p2)
}
  0x39   :  { %s2814_s0 = scalar_lea.vmem %s93_s10, 128  ;;  %p2819_p4 = scmp.lt.s32.totalorder %s93_s10, %s93_s10 }
  0x3a   :  { %p2815_p3 = scmp.ne.s32.totalorder %s93_s10, %s2814_s0  ;;  %p2820_p5 = scmp.lt.s32.totalorder %s2814_s0, %s2814_s0 }
  0x3c   :  { %p2821_p6 = por %p2820_p5, %p2819_p4 }
  0x3e   :  { %p2822_p7 = pnand %p2821_p6, %p2815_p3 }
  0x40   :  { %2825 = shalt.err (!%p2822_p7)
}
  0x41   :  { %95 = dma.hbm_to_vmem [thread:$0]  %s3169_s13, 128, %s93_s10, [#allocation5]  }
  0x42   :  { %s2826_s18 = scalar_lea.hbm %s3179_s21, 128 }
  0x43   :  { %p2827_p8 = scmp.ne.s32.totalorder %s3179_s21, %s2826_s18  ;;  %p2830_p9 = scmp.lt.u32.totalorder %s2826_s18, %s3179_s21 }
  0x45   :  { %p2832_p10 = pnand %p2830_p9, %p2827_p8 }
  0x47   :  { %2835 = shalt.err (!%p2832_p10)
}
  0x48   :  { %s2836_s22 = scalar_lea.vmem %s113_s15, 128  ;;  %p2841_p12 = scmp.lt.s32.totalorder %s113_s15, %s113_s15 }
  0x49   :  { %p2837_p11 = scmp.ne.s32.totalorder %s113_s15, %s2836_s22  ;;  %p2842_p13 = scmp.lt.s32.totalorder %s2836_s22, %s2836_s22 }
  0x4b   :  { %p2843_p0 = por %p2842_p13, %p2841_p12 }
  0x4d   :  { %p2844_p1 = pnand %p2843_p0, %p2837_p11 }
  0x4f   :  { %2847 = shalt.err (!%p2844_p1)
}
  0x50   :  { %115 = dma.hbm_to_vmem [thread:$0]  %s3179_s21, 128, %s113_s15, [#allocation8]  }
  0x51   :  { %s3135_s23 = smov [#allocation10]   ;;  %s3136_s13 = smov [#allocation13]  }
  0x52   :  { %s134_s26 = sshll.u32 %s3135_s23, 4  ;;  %s156_s28 = sshll.u32 %s3136_s13, 4  ;;  %s135_s26 = int_to_ptr.vmem [resolvable:$true] %s134_s26  ;;  %s157_s28 = int_to_ptr.vmem [resolvable:$true] %s156_s28 }
  0x53   :  { %s2848_s1 = scalar_lea.hbm %s3189_s29, 16 }
  0x54   :  { %p2849_p2 = scmp.ne.s32.totalorder %s3189_s29, %s2848_s1  ;;  %p2852_p3 = scmp.lt.u32.totalorder %s2848_s1, %s3189_s29 }
  0x56   :  { %p2854_p4 = pnand %p2852_p3, %p2849_p2 }
  0x58   :  { %2857 = shalt.err (!%p2854_p4)
}
  0x59   :  { %s2858_s2 = scalar_lea.vmem %s135_s26, 16  ;;  %s2862_s7 = scalar_lea.vmem %s135_s26, 32 }
  0x5a   :  { %p2859_p5 = scmp.ne.s32.totalorder %s135_s26, %s2858_s2  ;;  %p2863_p6 = scmp.lt.s32.totalorder %s135_s26, %s135_s26 }
  0x5b   :  { %p2864_p7 = scmp.lt.s32.totalorder %s2862_s7, %s2858_s2 }
  0x5d   :  { %p2865_p8 = por %p2864_p7, %p2863_p6 }
  0x5f   :  { %p2866_p9 = pnand %p2865_p8, %p2859_p5 }
  0x61   :  { %2869 = shalt.err (!%p2866_p9)
}
  0x62   :  { %137 = dma.hbm_to_vmem [thread:$0]  %s3189_s29, 16, %s135_s26, [#allocation11]  }
  0x63   :  { %s2870_s21 = scalar_lea.hbm %s3204_s14, 16 }
  0x64   :  { %p2871_p10 = scmp.ne.s32.totalorder %s3204_s14, %s2870_s21  ;;  %p2874_p11 = scmp.lt.u32.totalorder %s2870_s21, %s3204_s14 }
  0x66   :  { %p2876_p12 = pnand %p2874_p11, %p2871_p10 }
  0x68   :  { %2879 = shalt.err (!%p2876_p12)
}
  0x69   :  { %s2880_s10 = scalar_lea.vmem %s157_s28, 16  ;;  %s2884_s11 = scalar_lea.vmem %s157_s28, 32 }
  0x6a   :  { %p2881_p13 = scmp.ne.s32.totalorder %s157_s28, %s2880_s10  ;;  %p2885_p0 = scmp.lt.s32.totalorder %s157_s28, %s157_s28 }
  0x6b   :  { %p2886_p1 = scmp.lt.s32.totalorder %s2884_s11, %s2880_s10 }
  0x6d   :  { %p2887_p2 = por %p2886_p1, %p2885_p0 }
  0x6f   :  { %p2888_p3 = pnand %p2887_p2, %p2881_p13 }
  0x71   :  { %2891 = shalt.err (!%p2888_p3)
}
  0x72   :  { %159 = dma.hbm_to_vmem [thread:$0]  %s3204_s14, 16, %s157_s28, [#allocation14]  }
  0x73   :  { %s3137_s15 = smov [#allocation16]   ;;  %s3138_s16 = smov [#allocation19]  }
  0x74   :  { %s178_s29 = sshll.u32 %s3137_s15, 4  ;;  %s202_s0 = sshll.u32 %s3138_s16, 4  ;;  %s179_s29 = int_to_ptr.vmem [resolvable:$true] %s178_s29  ;;  %s203_s0 = int_to_ptr.vmem [resolvable:$true] %s202_s0 }
  0x75   :  { %s2892_s18 = scalar_lea.hbm %s3214_s24, 16 }
  0x76   :  { %p2893_p4 = scmp.ne.s32.totalorder %s3214_s24, %s2892_s18  ;;  %p2896_p5 = scmp.lt.u32.totalorder %s2892_s18, %s3214_s24 }
  0x78   :  { %p2898_p6 = pnand %p2896_p5, %p2893_p4 }
  0x7a   :  { %2901 = shalt.err (!%p2898_p6)
}
  0x7b   :  { %s2902_s22 = scalar_lea.vmem %s179_s29, 16  ;;  %s2906_s23 = scalar_lea.vmem %s179_s29, 32 }
  0x7c   :  { %p2903_p7 = scmp.ne.s32.totalorder %s179_s29, %s2902_s22  ;;  %p2907_p8 = scmp.lt.s32.totalorder %s179_s29, %s179_s29 }
  0x7d   :  { %p2908_p9 = scmp.lt.s32.totalorder %s2906_s23, %s2902_s22 }
  0x7f   :  { %p2909_p10 = por %p2908_p9, %p2907_p8 }
  0x81   :  { %p2910_p11 = pnand %p2909_p10, %p2903_p7 }
  0x83   :  { %2913 = shalt.err (!%p2910_p11)
}
  0x84   :  { %181 = dma.hbm_to_vmem [thread:$0]  %s3214_s24, 16, %s179_s29, [#allocation17]  }
  0x85   :  { %s2914_s14 = scalar_lea.hbm %s3234_s20, 16 }
  0x86   :  { %p2915_p12 = scmp.ne.s32.totalorder %s3234_s20, %s2914_s14  ;;  %p2918_p13 = scmp.lt.u32.totalorder %s2914_s14, %s3234_s20 }
  0x88   :  { %p2920_p0 = pnand %p2918_p13, %p2915_p12 }
  0x8a   :  { %2923 = shalt.err (!%p2920_p0)
}
  0x8b   :  { %s2924_s26 = scalar_lea.vmem %s203_s0, 16  ;;  %s2928_s13 = scalar_lea.vmem %s203_s0, 32 }
  0x8c   :  { %p2925_p1 = scmp.ne.s32.totalorder %s203_s0, %s2924_s26  ;;  %p2929_p2 = scmp.lt.s32.totalorder %s203_s0, %s203_s0 }
  0x8d   :  { %p2930_p3 = scmp.lt.s32.totalorder %s2928_s13, %s2924_s26 }
  0x8f   :  { %p2931_p4 = por %p2930_p3, %p2929_p2 }
  0x91   :  { %p2932_p5 = pnand %p2931_p4, %p2925_p1 }
  0x93   :  { %2935 = shalt.err (!%p2932_p5)
}
  0x94   :  { %205 = dma.hbm_to_vmem [thread:$0]  %s3234_s20, 16, %s203_s0, [#allocation20]  }
  0x95   :  { %s3139_s28 = smov [#allocation2]   ;;  %s2936_s1 = scalar_lea.hbm %s3164_s9, 256 }
  0x96   :  { %s79_s24 = sshll.u32 %s3139_s28, 4  ;;  %p2937_p6 = scmp.ne.s32.totalorder %s3164_s9, %s2936_s1  ;;  %s80_s24 = int_to_ptr.vmem [resolvable:$true] %s79_s24 }
  0x97   :  { %p2940_p7 = scmp.lt.u32.totalorder %s2936_s1, %s3164_s9 }
  0x99   :  { %p2942_p8 = pnand %p2940_p7, %p2937_p6 }
  0x9b   :  { %2945 = shalt.err (!%p2942_p8)
}
  0x9c   :  { %s2946_s2 = scalar_lea.vmem %s80_s24, 256  ;;  %p2951_p10 = scmp.lt.s32.totalorder %s80_s24, %s80_s24 }
  0x9d   :  { %p2947_p9 = scmp.ne.s32.totalorder %s80_s24, %s2946_s2  ;;  %p2952_p11 = scmp.lt.s32.totalorder %s2946_s2, %s2946_s2 }
  0x9f   :  { %p2953_p12 = por %p2952_p11, %p2951_p10 }
  0xa1   :  { %p2954_p13 = pnand %p2953_p12, %p2947_p9 }
  0xa3   :  { %2957 = shalt.err (!%p2954_p13)
}
  0xa4   :  { %s3140_s7 = smov 128   ;;  %s3141_s20 = smov 8  }
  0xa5   :  { %85 = dma.hbm_to_vmem [thread:$0]  %s3164_s9, 256, %s80_s24, [#allocation3], %s3140_s7, %s3140_s7, %s3141_s20  }
  0xa6   :  { %s3142_s21 = smov [#allocation6]   ;;  %s3143_s11 = smov [#allocation9]  }
  0xa7   :  { %s102_s10 = sshll.u32 %s3142_s21, 4  ;;  %s121_s15 = sshll.u32 %s3143_s11, 4  ;;  %s103_s10 = int_to_ptr.vmem [resolvable:$true] %s102_s10  ;;  %s122_s15 = int_to_ptr.vmem [resolvable:$true] %s121_s15 }
  0xa8   :  { %s2958_s29 = scalar_lea.hbm %s3174_s17, 16 }
  0xa9   :  { %p2959_p0 = scmp.ne.s32.totalorder %s3174_s17, %s2958_s29  ;;  %p2962_p1 = scmp.lt.u32.totalorder %s2958_s29, %s3174_s17 }
  0xab   :  { %p2964_p2 = pnand %p2962_p1, %p2959_p0 }
  0xad   :  { %2967 = shalt.err (!%p2964_p2)
}
  0xae   :  { %s2968_s16 = scalar_lea.vmem %s103_s10, 16  ;;  %s2972_s0 = scalar_lea.vmem %s103_s10, 32 }
  0xaf   :  { %p2969_p3 = scmp.ne.s32.totalorder %s103_s10, %s2968_s16  ;;  %p2973_p4 = scmp.lt.s32.totalorder %s103_s10, %s103_s10 }
  0xb0   :  { %p2974_p5 = scmp.lt.s32.totalorder %s2972_s0, %s2968_s16 }
  0xb2   :  { %p2975_p6 = por %p2974_p5, %p2973_p4 }
  0xb4   :  { %p2976_p7 = pnand %p2975_p6, %p2969_p3 }
  0xb6   :  { %2979 = shalt.err (!%p2976_p7)
}
  0xb7   :  { %105 = dma.hbm_to_vmem [thread:$0]  %s3174_s17, 16, %s103_s10, [#allocation5]  }
  0xb8   :  { %s2980_s9 = scalar_lea.hbm %s3184_s25, 256 }
  0xb9   :  { %p2981_p8 = scmp.ne.s32.totalorder %s3184_s25, %s2980_s9  ;;  %p2984_p9 = scmp.lt.u32.totalorder %s2980_s9, %s3184_s25 }
  0xbb   :  { %p2986_p10 = pnand %p2984_p9, %p2981_p8 }
  0xbd   :  { %2989 = shalt.err (!%p2986_p10)
}
  0xbe   :  { %s2990_s18 = scalar_lea.vmem %s122_s15, 256  ;;  %p2995_p12 = scmp.lt.s32.totalorder %s122_s15, %s122_s15 }
  0xbf   :  { %p2991_p11 = scmp.ne.s32.totalorder %s122_s15, %s2990_s18  ;;  %p2996_p13 = scmp.lt.s32.totalorder %s2990_s18, %s2990_s18 }
  0xc1   :  { %p2997_p0 = por %p2996_p13, %p2995_p12 }
  0xc3   :  { %p2998_p1 = pnand %p2997_p0, %p2991_p11 }
  0xc5   :  { %3001 = shalt.err (!%p2998_p1)
}
  0xc6   :  { %127 = dma.hbm_to_vmem [thread:$0]  %s3184_s25, 256, %s122_s15, [#allocation8], %s3140_s7, %s3140_s7, %s3141_s20  }
  0xc7   :  { %s3144_s17 = smov [#allocation12]   ;;  %s3145_s23 = smov [#allocation15]  }
  0xc8   :  { %s144_s22 = sshll.u32 %s3144_s17, 4  ;;  %s165_s14 = sshll.u32 %s3145_s23, 4  ;;  %s145_s22 = int_to_ptr.vmem [resolvable:$true] %s144_s22  ;;  %s166_s14 = int_to_ptr.vmem [resolvable:$true] %s165_s14 }
  0xc9   :  { %s3002_s26 = scalar_lea.hbm %s3194_s3, 128 }
  0xca   :  { %p3003_p2 = scmp.ne.s32.totalorder %s3194_s3, %s3002_s26  ;;  %p3006_p3 = scmp.lt.u32.totalorder %s3002_s26, %s3194_s3 }
  0xcc   :  { %p3008_p4 = pnand %p3006_p3, %p3003_p2 }
  0xce   :  { %3011 = shalt.err (!%p3008_p4)
}
  0xcf   :  { %s3012_s13 = scalar_lea.vmem %s145_s22, 128  ;;  %p3017_p6 = scmp.lt.s32.totalorder %s145_s22, %s145_s22 }
  0xd0   :  { %p3013_p5 = scmp.ne.s32.totalorder %s145_s22, %s3012_s13  ;;  %p3018_p7 = scmp.lt.s32.totalorder %s3012_s13, %s3012_s13 }
  0xd2   :  { %p3019_p8 = por %p3018_p7, %p3017_p6 }
  0xd4   :  { %p3020_p9 = pnand %p3019_p8, %p3013_p5 }
  0xd6   :  { %3023 = shalt.err (!%p3020_p9)
}
  0xd7   :  { %147 = dma.hbm_to_vmem [thread:$0]  %s3194_s3, 128, %s145_s22, [#allocation11]  }
  0xd8   :  { %s3024_s25 = scalar_lea.hbm %s3209_s19, 256 }
  0xd9   :  { %p3025_p10 = scmp.ne.s32.totalorder %s3209_s19, %s3024_s25  ;;  %p3028_p11 = scmp.lt.u32.totalorder %s3024_s25, %s3209_s19 }
  0xdb   :  { %p3030_p12 = pnand %p3028_p11, %p3025_p10 }
  0xdd   :  { %3033 = shalt.err (!%p3030_p12)
}
  0xde   :  { %s3034_s28 = scalar_lea.vmem %s166_s14, 256  ;;  %p3039_p0 = scmp.lt.s32.totalorder %s166_s14, %s166_s14 }
  0xdf   :  { %p3035_p13 = scmp.ne.s32.totalorder %s166_s14, %s3034_s28  ;;  %p3040_p1 = scmp.lt.s32.totalorder %s3034_s28, %s3034_s28 }
  0xe1   :  { %p3041_p2 = por %p3040_p1, %p3039_p0 }
  0xe3   :  { %p3042_p3 = pnand %p3041_p2, %p3035_p13 }
  0xe5   :  { %3045 = shalt.err (!%p3042_p3)
}
  0xe6   :  { %171 = dma.hbm_to_vmem [thread:$0]  %s3209_s19, 256, %s166_s14, [#allocation14], %s3140_s7, %s3140_s7, %s3141_s20  }
  0xe7   :  { %s3146_s3 = smov [#allocation18]   ;;  %s3147_s1 = smov [#allocation21]  }
  0xe8   :  { %s190_s24 = sshll.u32 %s3146_s3, 4  ;;  %s226_s2 = sshll.u32 %s3147_s1, 4  ;;  %s191_s24 = int_to_ptr.vmem [resolvable:$true] %s190_s24  ;;  %s227_s2 = int_to_ptr.vmem [resolvable:$true] %s226_s2 }
  0xe9   :  { %s3046_s21 = scalar_lea.hbm %s3224_s6, 16 }
  0xea   :  { %p3047_p4 = scmp.ne.s32.totalorder %s3224_s6, %s3046_s21  ;;  %p3050_p5 = scmp.lt.u32.totalorder %s3046_s21, %s3224_s6 }
  0xec   :  { %p3052_p6 = pnand %p3050_p5, %p3047_p4 }
  0xee   :  { %3055 = shalt.err (!%p3052_p6)
}
  0xef   :  { %s3056_s10 = scalar_lea.vmem %s191_s24, 16  ;;  %s3060_s11 = scalar_lea.vmem %s191_s24, 32 }
  0xf0   :  { %p3057_p7 = scmp.ne.s32.totalorder %s191_s24, %s3056_s10  ;;  %p3061_p8 = scmp.lt.s32.totalorder %s191_s24, %s191_s24 }
  0xf1   :  { %p3062_p9 = scmp.lt.s32.totalorder %s3060_s11, %s3056_s10 }
  0xf3   :  { %p3063_p10 = por %p3062_p9, %p3061_p8 }
  0xf5   :  { %p3064_p11 = pnand %p3063_p10, %p3057_p7 }
  0xf7   :  { %3067 = shalt.err (!%p3064_p11)
}
  0xf8   :  { %193 = dma.hbm_to_vmem [thread:$0]  %s3224_s6, 16, %s191_s24, [#allocation17]  }
  0xf9   :  { %s3068_s19 = scalar_lea.hbm %s3274_s30, 16 }
  0xfa   :  { %p3069_p12 = scmp.ne.s32.totalorder %s3274_s30, %s3068_s19  ;;  %p3072_p13 = scmp.lt.u32.totalorder %s3068_s19, %s3274_s30 }
  0xfc   :  { %p3074_p0 = pnand %p3072_p13, %p3069_p12 }
  0xfe   :  { %3077 = shalt.err (!%p3074_p0)
}
  0xff   :  { %s3078_s7 = scalar_lea.vmem %s227_s2, 16  ;;  %s3082_s20 = scalar_lea.vmem %s227_s2, 32 }
 0x100   :  { %p3079_p1 = scmp.ne.s32.totalorder %s227_s2, %s3078_s7  ;;  %p3083_p2 = scmp.lt.s32.totalorder %s227_s2, %s227_s2 }
 0x101   :  { %p3084_p3 = scmp.lt.s32.totalorder %s3082_s20, %s3078_s7 }
 0x103   :  { %p3085_p4 = por %p3084_p3, %p3083_p2 }
 0x105   :  { %p3086_p5 = pnand %p3085_p4, %p3079_p1 }
 0x107   :  { %3089 = shalt.err (!%p3086_p5)
}
 0x108   :  { %229 = dma.hbm_to_vmem [thread:$0]  %s3274_s30, 16, %s227_s2, [#allocation20]  }
 0x109   :  { %3090 = dma.done.wait [#allocation3], 256  }
 0x10a   :  { %3091 = vsyncadd [#allocation3], 4294967040 }
 0x10b   :  { %3092 = dma.done.wait [#allocation5], 144  }
 0x10c   :  { %3093 = vsyncadd [#allocation5], 4294967152 }
 0x10d   :  { %3094 = dma.done.wait [#allocation8], 384  }
 0x10e   :  { %3095 = vsyncadd [#allocation8], 4294966912 }
 0x10f   :  { %3096 = dma.done.wait [#allocation11], 144  }
 0x110   :  { %3097 = vsyncadd [#allocation11], 4294967152 }
 0x111   :  { %3098 = dma.done.wait [#allocation14], 272  }
 0x112   :  { %3099 = vsyncadd [#allocation14], 4294967024 }
 0x113   :  { %3100 = dma.done.wait [#allocation17], 32  }
 0x114   :  { %3101 = vsyncadd [#allocation17], 4294967264 }
 0x115   :  { %3102 = dma.done.wait [#allocation20], 32  }
 0x116   :  { %3103 = vsyncadd [#allocation20], 4294967264  ;;  %vm394_vm0 = vcmask 1043456   ;;  %vm294_vm1 = vcmask 1045504   ;;  %s3563_s6 = sld [smem:[#allocation29_spill]]  ;;  %vm287_vm2 = vcmask 48128  }
 0x117   :  { %vm3148_vm3 = vmmov 1   ;;  %vm387_vm5 = vcmask 97280   ;;  %v279_v1 = vld [vmem:[#allocation4] sm:$0x3f]  ;;  %v378_v3 = vld [vmem:[#allocation9] sm:$0xff]  ;;  %s3566_s30 = sld [smem:[#allocation30_spill]] }
 0x118   :  { %vm3367_vm4 = vmpackc.low %vm394_vm0, %vm3148_vm3  ;;  %v277_v2 = vld [vmem:[%s3159_s5] sm:$0xff]  ;;  %2421 = vmatprep.subr.msk.mxu0 %vm294_vm1, %v279_v1  ;;  %v379_v4 = vld [vmem:[#allocation9 + $0x8] sm:$0xf]  ;;  %vm487_vm6 = vcmask 261120   ;;  %vm667_vm7 = vcmask 130048   ;;  %s3150_s15 = smov 112  }
 0x119   :  { %2423 = vmatprep.mubr.msk.f32.mxu0 %vm287_vm2, %v277_v2  ;;  %v278_v5 = vld [vmem:[%s3159_s5 + $0x8] sm:$0xff]  ;;  %v376_v6 = vld [vmem:[#allocation2] sm:$0xff]  ;;  %2422 = vmatpush3.msk.msra.mxu0 %vm294_vm1, %v279_v1  ;;  %v2583_v7 = vpack.c.bf16 %v379_v4, %v378_v3  ;;  %v377_v11 = vld [vmem:[#allocation2 + $0x8] sm:$0xff]  ;;  %s3149_s5 = smov 96   ;;  %s3569_s29 = sld [smem:[#allocation31_spill]]  ;;  %vm2221_vm9 = vcmask 39936  }
 0x11a   :  { %2430 = vmatprep.mubr.msk.f32.mxu1 %vm387_vm5, %v376_v6  ;;  %2424 = vmatmul.mubr.msk.f32.vlgmr.msra.gmra.mrb[0].mxu0 %vm287_vm2, %v278_v5  ;;  %v2268_v21 = vld [vmem:[#allocation6] ss:$0 sm:$0xff]  ;;  %v373_v23 = vld [vmem:[#allocation7] sm:$0xff]  ;;  %v2272_v28 = vld [vmem:[#allocation10] ss:$0 sm:$0xff]  ;;  %s3570_s16 = sld [smem:[#allocation36_spill]] }
 0x11b   :  { %2585 = vmatprep.subr.msk.bf16.mxu1 %vm3367_vm4, %v2583_v7  ;;  %v473_v32 = vld [vmem:[#allocation12] sm:$0xff]  ;;  %v2276_v37 = vld [vmem:[#allocation13] ss:$0 sm:$0xff]  ;;  %v2279_v42 = vld [vmem:[#allocation18] ss:$0 sm:$0xff]  ;;  %s3571_s0 = sld [smem:[#allocation32_spill]] }
 0x11c   :  { %v476_v8 = vld [vmem:[%s3563_s6] sm:$0xff]  ;;  %v477_v9 = vld [vmem:[%s3563_s6 + $0x8] sm:$0xff]  ;;  %2588 = vmatpush3.bf16.msk.msra.mxu1 %vm3367_vm4, %v2583_v7  ;;  %v478_v15 = vld [vmem:[%s3563_s6 + $0x10] sm:$0xff]  ;;  %s3572_s9 = sld [smem:[#allocation37_spill]]  ;;  %s3573_s18 = sld [smem:[#allocation33_spill]]  ;;  %vm2126_vm10 = vcmask 31744  }
 0x11d   :  { %v2589_v10 = vpack.c.bf16 %v477_v9, %v476_v8  ;;  %v569_v12 = vld [vmem:[%s3566_s30] sm:$0xff]  ;;  %v570_v13 = vld [vmem:[%s3566_s30 + $0x8] sm:$0xff]  ;;  %v479_v16 = vld [vmem:[%s3563_s6 + $0x18] sm:$0xff]  ;;  %s3574_s17 = sld [smem:[#allocation34_spill]]  ;;  %s3575_s22 = sld [smem:[#allocation38_spill]] }
 0x11e   :  { %v2597_v14 = vpack.c.bf16 %v570_v13, %v569_v12  ;;  %v2593_v17 = vpack.c.bf16 %v479_v16, %v478_v15  ;;  %v571_v18 = vld [vmem:[%s3566_s30 + $0x10] sm:$0xff]  ;;  %v572_v19 = vld [vmem:[%s3566_s30 + $0x18] sm:$0xff]  ;;  %vm3413_vm8 = vmpackc.low %vm667_vm7, %vm667_vm7  ;;  %s3576_s23 = sld [smem:[#allocation39_spill]]  ;;  %s3577_s14 = sld [smem:[#allocation35_spill]] }
 0x11f   :  { %2590 = vmatprep.subr.bf16.mxu0 %v2589_v10  ;;  %2431 = vmatmul.mubr.msk.f32.vlgmr.msra.gmra.mrb[0].mxu1 %vm387_vm5, %v377_v11  ;;  %v2601_v20 = vpack.c.bf16 %v572_v19, %v571_v18  ;;  %s3578_s26 = sld [smem:[#allocation40_spill]] }
 0x120   :  { %2592 = vmatpush3.bf16.msra.mxu0 %v2589_v10  ;;  %2598 = vmatprep.subr.bf16.mxu1 %v2597_v14 }
 0x121   :  { %2594 = vmatprep.subr.bf16.mxu0 %v2593_v17  ;;  %2600 = vmatpush3.bf16.msra.mxu1 %v2597_v14 }
 0x122   :  { %2602 = vmatprep.subr.bf16.mxu1 %v2601_v20 }
 0x124   :  { %2596 = vmatpush3.bf16.msra.mxu0 %v2593_v17 }
 0x125   :  { %2604 = vmatpush3.bf16.msra.mxu1 %v2601_v20 }
 0x1ed   :  { %v2425_v22 = vpop.f32.mrb[0].mxu0 }
 0x1ee   :  { %v370_v24 = vadd.f32 %v2425_v22, %v2268_v21  ;;  %v364_v25 = vpop.f32.mrb[1].mxu0 }
 0x1ef   :  { %v365_v26 = vadd.f32 %v2268_v21, %v364_v25 }
 0x1f0   :  { %v3389_v27 = vadd.f32 %v373_v23, %v370_v24 }
 0x1f1   :  { %v3391_v29 = vadd.f32 %v373_v23, %v365_v26 }
 0x1f2   :  { %v2432_v30 = vpop.f32.mrb[0].mxu1 }
 0x1f3   :  { %v470_v31 = vadd.f32 %v2432_v30, %v2272_v28  ;;  %v464_v33 = vpop.f32.mrb[1].mxu1  ;;  %2441 = vmatprep.mubr.msk.f32.mxu0 %vm487_vm6, %v3391_v29 }
 0x1f4   :  { %v465_v34 = vadd.f32 %v2272_v28, %v464_v33  ;;  %2442 = vmatmul.mubr.msk.f32.vlgmr.msra.gmra.mrb[2].mxu0 %vm487_vm6, %v3389_v27 }
 0x1f5   :  { %v3399_v36 = vadd.f32 %v473_v32, %v470_v31 }
 0x1f6   :  { %v3397_v35 = vadd.f32 %v473_v32, %v465_v34 }
 0x1f8   :  { %2452 = vmatprep.mubr.msk.f32.mxu1 %vm487_vm6, %v3397_v35 }
 0x1f9   :  { %2453 = vmatmul.mubr.msk.f32.vlgmr.msra.gmra.mrb[2].mxu1 %vm487_vm6, %v3399_v36 }
 0x2c7   :  { %v2443_v38 = vpop.f32.mrb[2].mxu0 }
 0x2c8   :  { %v566_v39 = vadd.f32 %v2443_v38, %v2276_v37  ;;  %v560_v40 = vpop.f32.mrb[3].mxu0 }
 0x2c9   :  { %v561_v41 = vadd.f32 %v2276_v37, %v560_v40 }
 0x2ca   :  { %2466 = vmatprep.mubr.msk.f32.mxu1 %vm667_vm7, %v566_v39 }
 0x2cb   :  { %2459 = vmatprep.mubr.msk.f32.mxu0 %vm667_vm7, %v561_v41 }
 0x2cc   :  { %v2454_v43 = vpop.f32.mrb[2].mxu1 }
 0x2cd   :  { %v652_v44 = vpop.f32.mrb[3].mxu1  ;;  %v658_v46 = vadd.f32 %v2454_v43, %v2279_v42 }
 0x2ce   :  { %v653_v45 = vadd.f32 %v2279_v42, %v652_v44 }
 0x2cf   :  { %v2755_v48 = vpack.i.bf16 %v658_v46, %v566_v39 }
 0x2d0   :  { %v2750_v47 = vpack.i.bf16 %v653_v45, %v561_v41 }
 0x2d2   :  { %2751 = vrot.lane.b32.xlu1 %v2750_v47, %s3149_s5  ;;  %2741 = vrot.lane.b32.xlu0 %v2750_v47, %s3150_s15 }
 0x2d6   :  { %2756 = vrot.lane.b32.xlu1 %v2755_v48, %s3149_s5  ;;  %2746 = vrot.lane.b32.xlu0 %v2755_v48, %s3150_s15 }
 0x344   :  { %v2752_v49 = vpop.permute.xlu1 %2751  ;;  %v2742_v50 = vpop.permute.xlu0 %2741 }
 0x345   :  { %v2754_v51 = vunpack.i.h.bf16 %v2752_v49  ;;  %v2753_v52 = vunpack.i.l.bf16 %v2752_v49  ;;  %v2744_v53 = vunpack.i.h.bf16 %v2742_v50  ;;  %v2743_v54 = vunpack.i.l.bf16 %v2742_v50 }
 0x347   :  { %v2605_v56 = vpack.c.bf16 %v2744_v53, %v2743_v54  ;;  %v2617_v57 = vpack.c.bf16 %v2754_v51, %v2753_v52 }
 0x348   :  { %v2757_v58 = vpop.permute.xlu1 %2756  ;;  %v2747_v59 = vpop.permute.xlu0 %2746 }
 0x349   :  { %v2759_v60 = vunpack.i.h.bf16 %v2757_v58  ;;  %v2758_v61 = vunpack.i.l.bf16 %v2757_v58  ;;  %v2749_v62 = vunpack.i.h.bf16 %v2747_v59  ;;  %v2748_v63 = vunpack.i.l.bf16 %v2747_v59  ;;  %2607 = vmatprep.subr.msk.bf16.mxu0 %vm3413_vm8, %v2605_v56 }
 0x34a   :  { %2610 = vmatpush3.bf16.xpose.msk.msra.mxu0 %vm3413_vm8, %v2605_v56 }
 0x34b   :  { %v2611_v0 = vpack.c.bf16 %v2749_v62, %v2748_v63  ;;  %2618 = vmatprep.subr.bf16.mxu0 %v2617_v57  ;;  %v2621_v1 = vpack.c.bf16 %v2759_v60, %v2758_v61 }
 0x34d   :  { %2613 = vmatprep.subr.msk.bf16.mxu1 %vm3413_vm8, %v2611_v0 }
 0x34e   :  { %2616 = vmatpush3.bf16.xpose.msk.msra.mxu1 %vm3413_vm8, %v2611_v0 }
 0x34f   :  { %2622 = vmatprep.subr.bf16.mxu1 %v2621_v1 }
 0x351   :  { %2460 = vmatmul.mubr.msk.f32.vlgmr.msra.gmra.mrb[4].mxu0 %vm667_vm7, %v653_v45 }
 0x352   :  { %2620 = vmatpush3.bf16.msra.mxu0 %v2617_v57 }
 0x355   :  { %2467 = vmatmul.mubr.msk.f32.vlgmr.msra.gmra.mrb[4].mxu1 %vm667_vm7, %v658_v46 }
 0x356   :  { %2624 = vmatpush3.bf16.msra.mxu1 %v2621_v1  ;;  %v1162_v1 = vld [vmem:[%s3569_s29] sm:$0xff] }
 0x424   :  { %v2461_v2 = vpop.f32.mrb[4].mxu0 }
 0x425   :  { %v841_v3 = vsel %vm667_vm7, %v2461_v2, -inf  ;;  %v742_v4 = vpop.f32.mrb[5].mxu0 }
 0x426   :  { %v840_v5 = vsel %vm667_vm7, %v742_v4, -inf }
 0x427   :  { %v842_v6 = vmax.f32 %v840_v5, %v841_v3  ;;  %v1068_v3 = vld [vmem:[#allocation15] sm:$0xff] }
 0x428   :  { %v2468_v7 = vpop.f32.mrb[4].mxu1 }
 0x429   :  { %v843_v8 = vrot.slane %v842_v6, 4  ;;  %v850_v9 = vsel %vm667_vm7, %v2468_v7, -inf  ;;  %v831_v10 = vpop.f32.mrb[5].mxu1 }
 0x42a   :  { %v849_v11 = vsel %vm667_vm7, %v831_v10, -inf }
 0x42b   :  { %v844_v12 = vmax.f32 %v842_v6, %v843_v8  ;;  %v851_v13 = vmax.f32 %v849_v11, %v850_v9  ;;  %v1348_v11 = vld [vmem:[%s3570_s16] sm:$0xff] }
 0x42d   :  { %v845_v14 = vrot.slane %v844_v12, 2  ;;  %v852_v15 = vrot.slane %v851_v13, 4 }
 0x42f   :  { %v846_v16 = vmax.f32 %v844_v12, %v845_v14  ;;  %v853_v17 = vmax.f32 %v851_v13, %v852_v15  ;;  %v1349_v12 = vld [vmem:[%s3570_s16 + $0x8] sm:$0xff]  ;;  %v1256_v14 = vld [vmem:[%s3571_s0] sm:$0xff] }
 0x430   :  { %v2641_v13 = vpack.c.bf16 %v1349_v12, %v1348_v11  ;;  %v1257_v15 = vld [vmem:[%s3571_s0 + $0x8] sm:$0xff] }
 0x431   :  { %v847_v18 = vrot.slane %v846_v16, 1  ;;  %v854_v19 = vrot.slane %v853_v17, 2 }
 0x433   :  { %v848_v20 = vmax.f32 %v846_v16, %v847_v18  ;;  %v855_v21 = vmax.f32 %v853_v17, %v854_v19  ;;  %v2633_v16 = vpack.c.bf16 %v1257_v15, %v1256_v14  ;;  %v1350_v17 = vld [vmem:[%s3570_s16 + $0x10] sm:$0xff]  ;;  %v1351_v18 = vld [vmem:[%s3570_s16 + $0x18] sm:$0xff] }
 0x434   :  { %v2645_v19 = vpack.c.bf16 %v1351_v18, %v1350_v17 }
 0x435   :  { %v858_v22 = vsub.f32 %v742_v4, %v848_v20  ;;  %v859_v23 = vsub.f32 %v2461_v2, %v848_v20  ;;  %v856_v24 = vrot.slane %v855_v21, 1  ;;  %v1163_v2 = vld [vmem:[%s3569_s29 + $0x8] sm:$0xff]  ;;  %v1069_v4 = vld [vmem:[#allocation15 + $0x8] sm:$0xff] }
 0x436   :  { %v2629_v5 = vpack.c.bf16 %v1163_v2, %v1162_v1  ;;  %v2625_v6 = vpack.c.bf16 %v1069_v4, %v1068_v3  ;;  %v1258_v20 = vld [vmem:[%s3571_s0 + $0x10] sm:$0xff] }
 0x437   :  { %v862_v25 = vmul.f32 1.442695, %v858_v22  ;;  %v864_v26 = vmul.f32 1.442695, %v859_v23  ;;  %v857_v28 = vmax.f32 %v855_v21, %v856_v24  ;;  %v1259_v21 = vld [vmem:[%s3571_s0 + $0x18] sm:$0xff] }
 0x438   :  { %2630 = vmatprep.subr.bf16.mxu1 %v2629_v5  ;;  %2626 = vmatprep.subr.bf16.mxu0 %v2625_v6  ;;  %v2637_v22 = vpack.c.bf16 %v1259_v21, %v1258_v20  ;;  %v2297_v23 = vld [vmem:[#allocation19] ss:$0 sm:$0xff]  ;;  %v2294_v24 = vld [vmem:[#allocation16] ss:$0 sm:$0xff] }
 0x439   :  { %2780 = vpow2.f32 %v862_v25  ;;  %v860_v30 = vsub.f32 %v831_v10, %v857_v28  ;;  %v861_v31 = vsub.f32 %v2468_v7, %v857_v28 }
 0x43a   :  { %2782 = vpow2.f32 %v864_v26 }
 0x43b   :  { %v866_v32 = vmul.f32 1.442695, %v860_v30  ;;  %v868_v33 = vmul.f32 1.442695, %v861_v31 }
 0x43d   :  { %2784 = vpow2.f32 %v866_v32 }
 0x43e   :  { %2786 = vpow2.f32 %v868_v33 }
 0x443   :  { %v2781_v34 = vpop.eup %2780 }
 0x444   :  { %v2783_v37 = vpop.eup %2782  ;;  %v870_v38 = vsel %vm667_vm7, %v2781_v34, 0.0 }
 0x445   :  { %v871_v39 = vsel %vm667_vm7, %v2783_v37, 0.0 }
 0x446   :  { %v872_v40 = vadd.f32 %v871_v39, %v870_v38 }
 0x447   :  { %v2785_v41 = vpop.eup %2784 }
 0x448   :  { %v2787_v42 = vpop.eup %2786  ;;  %v873_v43 = vrot.slane %v872_v40, 4  ;;  %v879_v44 = vsel %vm667_vm7, %v2785_v41, 0.0 }
 0x449   :  { %v880_v45 = vsel %vm667_vm7, %v2787_v42, 0.0 }
 0x44a   :  { %v874_v46 = vadd.f32 %v873_v43, %v872_v40  ;;  %v881_v47 = vadd.f32 %v880_v45, %v879_v44 }
 0x44c   :  { %v875_v48 = vrot.slane %v874_v46, 2  ;;  %v882_v49 = vrot.slane %v881_v47, 4 }
 0x44e   :  { %v876_v50 = vadd.f32 %v875_v48, %v874_v46  ;;  %v883_v51 = vadd.f32 %v882_v49, %v881_v47 }
 0x450   :  { %v877_v52 = vrot.slane %v876_v50, 1  ;;  %v884_v53 = vrot.slane %v883_v51, 2 }
 0x452   :  { %v885_v54 = vadd.f32 %v884_v53, %v883_v51  ;;  %v878_v56 = vadd.f32 %v877_v52, %v876_v50 }
 0x454   :  { %v886_v57 = vrot.slane %v885_v54, 1  ;;  %2788 = vrcp.f32 %v878_v56 }
 0x456   :  { %v887_v58 = vadd.f32 %v886_v57, %v885_v54 }
 0x458   :  { %2790 = vrcp.f32 %v887_v58 }
 0x45e   :  { %v2789_v59 = vpop.eup %2788 }
 0x45f   :  { %v889_v60 = vmul.f32 %v2789_v59, %v2781_v34  ;;  %v890_v61 = vmul.f32 %v2789_v59, %v2783_v37 }
 0x461   :  { %2473 = vmatprep.mubr.msk.f32.mxu0 %vm667_vm7, %v889_v60 }
 0x462   :  { %v2791_v62 = vpop.eup %2790  ;;  %2474 = vmatmul.mubr.msk.f32.vlgmr.msra.gmra.mrb[6].mxu0 %vm667_vm7, %v890_v61 }
 0x463   :  { %v892_v63 = vmul.f32 %v2791_v62, %v2785_v41  ;;  %v893_v0 = vmul.f32 %v2791_v62, %v2787_v42  ;;  %2628 = vmatpush3.bf16.msra.mxu0 %v2625_v6  ;;  %v1846_v6 = vld [vmem:[%s3574_s17] sm:$0xff] }
 0x464   :  { %2634 = vmatprep.subr.bf16.mxu0 %v2633_v16 }
 0x465   :  { %2480 = vmatprep.mubr.msk.f32.mxu1 %vm667_vm7, %v892_v63 }
 0x466   :  { %2481 = vmatmul.mubr.msk.f32.vlgmr.msra.gmra.mrb[6].mxu1 %vm667_vm7, %v893_v0 }
 0x467   :  { %2632 = vmatpush3.bf16.msra.mxu1 %v2629_v5 }
 0x468   :  { %2642 = vmatprep.subr.bf16.mxu1 %v2641_v13 }
 0x535   :  { %v2475_v7 = vpop.f32.mrb[6].mxu0 }
 0x536   :  { %v972_v8 = vpop.f32.mrb[7].mxu0  ;;  %2494 = vmatprep.mubr.msk.f32.mxu1 %vm667_vm7, %v2475_v7  ;;  %v1847_v7 = vld [vmem:[%s3574_s17 + $0x8] sm:$0xff] }
 0x537   :  { %2487 = vmatprep.mubr.msk.f32.mxu0 %vm667_vm7, %v972_v8  ;;  %v1940_v8 = vld [vmem:[%s3575_s22] sm:$0xff] }
 0x539   :  { %v2482_v9 = vpop.f32.mrb[6].mxu1 }
 0x53a   :  { %v1059_v10 = vpop.f32.mrb[7].mxu1  ;;  %2495 = vmatmul.mubr.msk.f32.vlgmr.msra.gmra.mrb[8].mxu1 %vm667_vm7, %v2482_v9  ;;  %v3494_v9 = vpack.c.bf16 %v1847_v7, %v1846_v6 }
 0x53b   :  { %2488 = vmatmul.mubr.msk.f32.vlgmr.msra.gmra.mrb[8].mxu0 %vm667_vm7, %v1059_v10  ;;  %2644 = vmatpush3.bf16.msra.mxu1 %v2641_v13  ;;  %v1941_v10 = vld [vmem:[%s3575_s22 + $0x8] sm:$0xff] }
 0x53c   :  { %2636 = vmatpush3.bf16.msra.mxu0 %v2633_v16  ;;  %2646 = vmatprep.subr.bf16.mxu1 %v2645_v19  ;;  %v3497_v11 = vpack.c.bf16 %v1941_v10, %v1940_v8 }
 0x53d   :  { %2638 = vmatprep.subr.bf16.mxu0 %v2637_v22 }
 0x53f   :  { %2648 = vmatpush3.bf16.msra.mxu1 %v2645_v19 }
 0x540   :  { %2640 = vmatpush3.bf16.msra.mxu0 %v2637_v22 }
 0x60d   :  { %v2496_v25 = vpop.f32.mrb[8].mxu1 }
 0x60e   :  { %v1249_v26 = vadd.f32 %v2496_v25, %v2297_v23  ;;  %v2489_v28 = vpop.f32.mrb[8].mxu0  ;;  %v1243_v30 = vpop.f32.mrb[9].mxu1 }
 0x60f   :  { %v1155_v31 = vadd.f32 %v2489_v28, %v2294_v24  ;;  %v1244_v32 = vadd.f32 %v2297_v23, %v1243_v30  ;;  %v1149_v33 = vpop.f32.mrb[9].mxu0 }
 0x610   :  { %v1253_v34 = vmax.f32 %v1249_v26, 0.0  ;;  %v1150_v37 = vadd.f32 %v2294_v24, %v1149_v33 }
 0x611   :  { %v1159_v38 = vmax.f32 %v1155_v31, 0.0  ;;  %v1252_v39 = vmax.f32 %v1244_v32, 0.0 }
 0x612   :  { %v1158_v40 = vmax.f32 %v1150_v37, 0.0  ;;  %v3457_v42 = vadd.f32 %v1253_v34, %v3399_v36  ;;  %v2300_v36 = vld [vmem:[%s3573_s18] ss:$0 sm:$0xff] }
 0x613   :  { %v3454_v41 = vadd.f32 %v1252_v39, %v3397_v35  ;;  %v3463_v44 = vadd.f32 %v1159_v38, %v3389_v27  ;;  %v2303_v35 = vld [vmem:[%s3572_s9] ss:$0 sm:$0xff] }
 0x614   :  { %v3460_v43 = vadd.f32 %v1158_v40, %v3391_v29 }
 0x615   :  { %2516 = vmatprep.mubr.msk.f32.mxu1 %vm487_vm6, %v3454_v41 }
 0x616   :  { %2505 = vmatprep.mubr.msk.f32.mxu0 %vm487_vm6, %v3460_v43  ;;  %2517 = vmatmul.mubr.msk.f32.vlgmr.msra.gmra.mrb[10].mxu1 %vm487_vm6, %v3457_v42 }
 0x617   :  { %2506 = vmatmul.mubr.msk.f32.vlgmr.msra.gmra.mrb[10].mxu0 %vm487_vm6, %v3463_v44 }
 0x6e9   :  { %v2518_v45 = vpop.f32.mrb[10].mxu1 }
 0x6ea   :  { %v1437_v29 = vadd.f32 %v2518_v45, %v2303_v35  ;;  %v2507_v46 = vpop.f32.mrb[10].mxu0  ;;  %v1431_v47 = vpop.f32.mrb[11].mxu1 }
 0x6eb   :  { %v1345_v27 = vadd.f32 %v2507_v46, %v2300_v36  ;;  %v1432_v48 = vadd.f32 %v2303_v35, %v1431_v47  ;;  %v1339_v49 = vpop.f32.mrb[11].mxu0 }
 0x6ec   :  { %v1340_v50 = vadd.f32 %v2300_v36, %v1339_v49 }
 0x6ed   :  { %2530 = vmatprep.mubr.msk.f32.mxu1 %vm667_vm7, %v1345_v27  ;;  %v2765_v51 = vpack.i.bf16 %v1437_v29, %v1345_v27 }
 0x6ee   :  { %2523 = vmatprep.mubr.msk.f32.mxu0 %vm667_vm7, %v1340_v50  ;;  %v2760_v52 = vpack.i.bf16 %v1432_v48, %v1340_v50 }
 0x6ef   :  { %2766 = vrot.lane.b32.xlu1 %v2765_v51, %s3150_s15 }
 0x6f0   :  { %2761 = vrot.lane.b32.xlu0 %v2760_v52, %s3150_s15 }
 0x6f3   :  { %2776 = vrot.lane.b32.xlu1 %v2765_v51, %s3149_s5 }
 0x6f4   :  { %2771 = vrot.lane.b32.xlu0 %v2760_v52, %s3149_s5 }
 0x761   :  { %v2767_v53 = vpop.permute.xlu1 %2766 }
 0x762   :  { %v2769_v54 = vunpack.i.h.bf16 %v2767_v53  ;;  %v2768_v56 = vunpack.i.l.bf16 %v2767_v53  ;;  %v2762_v57 = vpop.permute.xlu0 %2761 }
 0x763   :  { %v2764_v58 = vunpack.i.h.bf16 %v2762_v57  ;;  %v2763_v59 = vunpack.i.l.bf16 %v2762_v57 }
 0x764   :  { %v2655_v60 = vpack.c.bf16 %v2769_v54, %v2768_v56 }
 0x765   :  { %v2649_v61 = vpack.c.bf16 %v2764_v58, %v2763_v59  ;;  %v2777_v62 = vpop.permute.xlu1 %2776 }
 0x766   :  { %v2779_v63 = vunpack.i.h.bf16 %v2777_v62  ;;  %v2778_v0 = vunpack.i.l.bf16 %v2777_v62  ;;  %2657 = vmatprep.subr.msk.bf16.mxu1 %vm3413_vm8, %v2655_v60  ;;  %v2772_v1 = vpop.permute.xlu0 %2771 }
 0x767   :  { %v2774_v2 = vunpack.i.h.bf16 %v2772_v1  ;;  %v2773_v3 = vunpack.i.l.bf16 %v2772_v1  ;;  %2651 = vmatprep.subr.msk.bf16.mxu0 %vm3413_vm8, %v2649_v61  ;;  %2660 = vmatpush3.bf16.xpose.msk.msra.mxu1 %vm3413_vm8, %v2655_v60 }
 0x768   :  { %v2665_v4 = vpack.c.bf16 %v2779_v63, %v2778_v0  ;;  %2654 = vmatpush3.bf16.xpose.msk.msra.mxu0 %vm3413_vm8, %v2649_v61 }
 0x769   :  { %v2661_v5 = vpack.c.bf16 %v2774_v2, %v2773_v3 }
 0x76a   :  { %2666 = vmatprep.subr.bf16.mxu1 %v2665_v4 }
 0x76b   :  { %2662 = vmatprep.subr.bf16.mxu0 %v2661_v5 }
 0x76e   :  { %2531 = vmatmul.mubr.msk.f32.vlgmr.msra.gmra.mrb[12].mxu1 %vm667_vm7, %v1437_v29 }
 0x76f   :  { %2524 = vmatmul.mubr.msk.f32.vlgmr.msra.gmra.mrb[12].mxu0 %vm667_vm7, %v1432_v48  ;;  %2668 = vmatpush3.bf16.msra.mxu1 %v2665_v4 }
 0x770   :  { %2664 = vmatpush3.bf16.msra.mxu0 %v2661_v5  ;;  %2674 = vmatprep.subr.bf16.mxu1 %v3497_v11 }
 0x771   :  { %2670 = vmatprep.subr.bf16.mxu0 %v3494_v9 }
 0x841   :  { %v2532_v55 = vpop.f32.mrb[12].mxu1 }
 0x842   :  { %v1628_v12 = vsel %vm667_vm7, %v2532_v55, -inf  ;;  %v2525_v13 = vpop.f32.mrb[12].mxu0  ;;  %v1609_v14 = vpop.f32.mrb[13].mxu1 }
 0x843   :  { %v1619_v15 = vsel %vm667_vm7, %v2525_v13, -inf  ;;  %v1627_v16 = vsel %vm667_vm7, %v1609_v14, -inf  ;;  %v1520_v17 = vpop.f32.mrb[13].mxu0 }
 0x844   :  { %v1629_v18 = vmax.f32 %v1627_v16, %v1628_v12  ;;  %v1618_v19 = vsel %vm667_vm7, %v1520_v17, -inf }
 0x845   :  { %v1620_v20 = vmax.f32 %v1618_v19, %v1619_v15  ;;  %v2130_v15 = vld [vmem:[%s3289_s12 + $0x8] sm:$0xff]  ;;  %v2131_v19 = vld [vmem:[%s3289_s12 + $0x10] sm:$0xff] }
 0x846   :  { %v1630_v21 = vrot.slane %v1629_v18, 4 }
 0x847   :  { %v1621_v22 = vrot.slane %v1620_v20, 4 }
 0x848   :  { %v1631_v23 = vmax.f32 %v1629_v18, %v1630_v21 }
 0x849   :  { %v1622_v24 = vmax.f32 %v1620_v20, %v1621_v22  ;;  %v2132_v20 = vld [vmem:[%s3289_s12 + $0x18] sm:$0xff]  ;;  %v2036_v22 = vld [vmem:[%s3576_s23 + $0x10] sm:$0xff] }
 0x84a   :  { %v1632_v25 = vrot.slane %v1631_v23, 2  ;;  %v2689_v21 = vpack.c.bf16 %v2132_v20, %v2131_v19 }
 0x84b   :  { %v1623_v26 = vrot.slane %v1622_v24, 2 }
 0x84c   :  { %v1633_v28 = vmax.f32 %v1631_v23, %v1632_v25  ;;  %v2037_v23 = vld [vmem:[%s3576_s23 + $0x18] sm:$0xff]  ;;  %v2321_v25 = vld [vmem:[#allocation21] ss:$0 sm:$0xff] }
 0x84d   :  { %v1624_v30 = vmax.f32 %v1622_v24, %v1623_v26  ;;  %v2681_v24 = vpack.c.bf16 %v2037_v23, %v2036_v22  ;;  %v2318_v26 = vld [vmem:[%s3577_s14] ss:$0 sm:$0xff] }
 0x84e   :  { %v1634_v31 = vrot.slane %v1633_v28, 1 }
 0x84f   :  { %v1625_v32 = vrot.slane %v1624_v30, 1 }
 0x850   :  { %v1635_v33 = vmax.f32 %v1633_v28, %v1634_v31 }
 0x851   :  { %v1626_v34 = vmax.f32 %v1624_v30, %v1625_v32 }
 0x852   :  { %v1638_v37 = vsub.f32 %v1609_v14, %v1635_v33  ;;  %v1639_v38 = vsub.f32 %v2532_v55, %v1635_v33 }
 0x853   :  { %v1636_v39 = vsub.f32 %v1520_v17, %v1626_v34  ;;  %v1637_v40 = vsub.f32 %v2525_v13, %v1626_v34  ;;  %v2035_v17 = vld [vmem:[%s3576_s23 + $0x8] sm:$0xff] }
 0x854   :  { %v1644_v35 = vmul.f32 1.442695, %v1638_v37  ;;  %v1646_v36 = vmul.f32 1.442695, %v1639_v38 }
 0x855   :  { %v1640_v45 = vmul.f32 1.442695, %v1636_v39  ;;  %v1642_v29 = vmul.f32 1.442695, %v1637_v40 }
 0x856   :  { %2792 = vpow2.f32 %v1644_v35 }
 0x857   :  { %2794 = vpow2.f32 %v1646_v36 }
 0x858   :  { %2796 = vpow2.f32 %v1640_v45 }
 0x859   :  { %2798 = vpow2.f32 %v1642_v29 }
 0x860   :  { %v2793_v46 = vpop.eup %2792 }
 0x861   :  { %v2795_v47 = vpop.eup %2794  ;;  %v1657_v27 = vsel %vm667_vm7, %v2793_v46, 0.0 }
 0x862   :  { %v2797_v48 = vpop.eup %2796  ;;  %v1658_v49 = vsel %vm667_vm7, %v2795_v47, 0.0 }
 0x863   :  { %v2799_v50 = vpop.eup %2798  ;;  %v1659_v51 = vadd.f32 %v1658_v49, %v1657_v27  ;;  %v1648_v52 = vsel %vm667_vm7, %v2797_v48, 0.0  ;;  %v2327_v27 = vld [vmem:[%s3294_s8] ss:$0 sm:$0xff] }
 0x864   :  { %v1649_v53 = vsel %vm667_vm7, %v2799_v50, 0.0 }
 0x865   :  { %v1660_v54 = vrot.slane %v1659_v51, 4  ;;  %v1650_v56 = vadd.f32 %v1649_v53, %v1648_v52 }
 0x867   :  { %v1661_v57 = vadd.f32 %v1660_v54, %v1659_v51  ;;  %v1651_v58 = vrot.slane %v1650_v56, 4 }
 0x869   :  { %v1662_v59 = vrot.slane %v1661_v57, 2  ;;  %v1652_v60 = vadd.f32 %v1651_v58, %v1650_v56 }
 0x86b   :  { %v1663_v61 = vadd.f32 %v1662_v59, %v1661_v57  ;;  %v1653_v62 = vrot.slane %v1652_v60, 2 }
 0x86d   :  { %v1664_v63 = vrot.slane %v1663_v61, 1  ;;  %v1654_v0 = vadd.f32 %v1653_v62, %v1652_v60 }
 0x86f   :  { %v1655_v1 = vrot.slane %v1654_v0, 1  ;;  %v1665_v2 = vadd.f32 %v1664_v63, %v1663_v61 }
 0x871   :  { %2800 = vrcp.f32 %v1665_v2  ;;  %v1656_v3 = vadd.f32 %v1655_v1, %v1654_v0 }
 0x873   :  { %2802 = vrcp.f32 %v1656_v3 }
 0x87b   :  { %v2801_v4 = vpop.eup %2800 }
 0x87c   :  { %v1670_v5 = vmul.f32 %v2801_v4, %v2793_v46  ;;  %v1671_v6 = vmul.f32 %v2801_v4, %v2795_v47 }
 0x87d   :  { %v2803_v7 = vpop.eup %2802 }
 0x87e   :  { %2544 = vmatprep.mubr.msk.f32.mxu1 %vm667_vm7, %v1670_v5  ;;  %v1667_v8 = vmul.f32 %v2803_v7, %v2797_v48  ;;  %v1668_v10 = vmul.f32 %v2803_v7, %v2799_v50 }
 0x87f   :  { %2545 = vmatmul.mubr.msk.f32.vlgmr.msra.gmra.mrb[14].mxu1 %vm667_vm7, %v1671_v6 }
 0x880   :  { %2537 = vmatprep.mubr.msk.f32.mxu0 %vm667_vm7, %v1667_v8  ;;  %2676 = vmatpush3.bf16.msra.mxu1 %v3497_v11  ;;  %v2129_v11 = vld [vmem:[%s3289_s12] sm:$0xff] }
 0x881   :  { %2538 = vmatmul.mubr.msk.f32.vlgmr.msra.gmra.mrb[14].mxu0 %vm667_vm7, %v1668_v10  ;;  %v2685_v16 = vpack.c.bf16 %v2130_v15, %v2129_v11 }
 0x882   :  { %2672 = vmatpush3.bf16.msra.mxu0 %v3494_v9  ;;  %v2034_v9 = vld [vmem:[%s3576_s23] sm:$0xff] }
 0x883   :  { %v2677_v18 = vpack.c.bf16 %v2035_v17, %v2034_v9  ;;  %2686 = vmatprep.subr.bf16.mxu1 %v2685_v16 }
 0x885   :  { %2678 = vmatprep.subr.bf16.mxu0 %v2677_v18 }
 0x952   :  { %v2546_v55 = vpop.f32.mrb[14].mxu1 }
 0x953   :  { %v1837_v12 = vpop.f32.mrb[15].mxu1 }
 0x954   :  { %v2539_v13 = vpop.f32.mrb[14].mxu0 }
 0x955   :  { %v1750_v14 = vpop.f32.mrb[15].mxu0  ;;  %2558 = vmatprep.mubr.msk.f32.mxu1 %vm667_vm7, %v2539_v13 }
 0x956   :  { %2551 = vmatprep.mubr.msk.f32.mxu0 %vm667_vm7, %v1750_v14  ;;  %2559 = vmatmul.mubr.msk.f32.vlgmr.msra.gmra.mrb[16].mxu1 %vm667_vm7, %v2546_v55 }
 0x957   :  { %2552 = vmatmul.mubr.msk.f32.vlgmr.msra.gmra.mrb[16].mxu0 %vm667_vm7, %v1837_v12  ;;  %2688 = vmatpush3.bf16.msra.mxu1 %v2685_v16 }
 0x958   :  { %2680 = vmatpush3.bf16.msra.mxu0 %v2677_v18  ;;  %2690 = vmatprep.subr.bf16.mxu1 %v2689_v21 }
 0x959   :  { %2682 = vmatprep.subr.bf16.mxu0 %v2681_v24 }
 0x95b   :  { %2692 = vmatpush3.bf16.msra.mxu1 %v2689_v21 }
 0x95c   :  { %2684 = vmatpush3.bf16.msra.mxu0 %v2681_v24 }
 0xa29   :  { %v2560_v28 = vpop.f32.mrb[16].mxu1 }
 0xa2a   :  { %v2027_v30 = vadd.f32 %v2560_v28, %v2321_v25  ;;  %v2553_v31 = vpop.f32.mrb[16].mxu0  ;;  %v2021_v32 = vpop.f32.mrb[17].mxu1 }
 0xa2b   :  { %v1933_v33 = vadd.f32 %v2553_v31, %v2318_v26  ;;  %v2022_v34 = vadd.f32 %v2321_v25, %v2021_v32  ;;  %v1927_v37 = vpop.f32.mrb[17].mxu0 }
 0xa2c   :  { %v2031_v38 = vmax.f32 %v2027_v30, 0.0  ;;  %v1928_v39 = vadd.f32 %v2318_v26, %v1927_v37 }
 0xa2d   :  { %v1937_v40 = vmax.f32 %v1933_v33, 0.0  ;;  %v2030_v35 = vmax.f32 %v2022_v34, 0.0 }
 0xa2e   :  { %v1936_v36 = vmax.f32 %v1928_v39, 0.0  ;;  %v2033_v29 = vadd.f32 %v2031_v38, %v3457_v42 }
 0xa2f   :  { %v2032_v45 = vadd.f32 %v2030_v35, %v3454_v41  ;;  %v1939_v47 = vadd.f32 %v1937_v40, %v3463_v44  ;;  %v2324_v41 = vld [vmem:[%s3578_s26] ss:$0 sm:$0xff] }
 0xa30   :  { %v1938_v46 = vadd.f32 %v1936_v36, %v3460_v43 }
 0xa31   :  { %2580 = vmatprep.mubr.msk.f32.mxu1 %vm487_vm6, %v2032_v45 }
 0xa32   :  { %2569 = vmatprep.mubr.msk.f32.mxu0 %vm487_vm6, %v1938_v46  ;;  %2581 = vmatmul.mubr.msk.f32.vlgmr.msra.gmra.mrb[18].mxu1 %vm487_vm6, %v2033_v29 }
 0xa33   :  { %2570 = vmatmul.mubr.msk.f32.vlgmr.msra.gmra.mrb[18].mxu0 %vm487_vm6, %v1939_v47 }
 0xb05   :  { %v2582_v48 = vpop.f32.mrb[18].mxu1 }
 0xb06   :  { %v2218_v42 = vadd.f32 %v2582_v48, %v2327_v27  ;;  %v2571_v43 = vpop.f32.mrb[18].mxu0  ;;  %v2212_v44 = vpop.f32.mrb[19].mxu1 }
 0xb07   :  { %v2123_v49 = vadd.f32 %v2571_v43, %v2324_v41  ;;  %v2213_v50 = vadd.f32 %v2327_v27, %v2212_v44  ;;  %v2117_v51 = vpop.f32.mrb[19].mxu0 }
 0xb08   :  { %2223 = vst.msk [vmem:[%s3304_s4 + $0x8] sm:$0xff] %vm2221_vm9, %v2218_v42  ;;  %v2118_v52 = vadd.f32 %v2324_v41, %v2117_v51 }
 0xb09   :  { %2128 = vst.msk [vmem:[%s3299_s27 + $0x8] sm:$0xff] %vm2126_vm10, %v2123_v49 }
 0xb0a   :  { %2222 = vst.msk [vmem:[%s3304_s4] sm:$0xff] %vm2221_vm9, %v2213_v50 }
 0xb0b   :  { %2127 = vst.msk [vmem:[%s3299_s27] sm:$0xff] %vm2126_vm10, %v2118_v52 }
 0xb0c   :  { %2232 = vsyncpa [#allocation3], 1 }
 0xb0d   :  { %2233 = vsyncpa [#allocation5], 1 }
 0xb0e   :  { %2234 = vsyncpa [#allocation8], 1 }
 0xb0f   :  { %2235 = vsyncpa [#allocation11], 1 }
 0xb10   :  { %2236 = vsyncpa [#allocation14], 1 }
 0xb11   :  { %2237 = vsyncpa [#allocation17], 1 }
 0xb12   :  { %2238 = vsyncpa [#allocation20], 1 }

</bundles_post_ra>
